<compile_context>
chip_gen: v7x
topology: tpu7x:2x2x1
jax: 0.10.0
libtpu: 0.0.40
codegen_flags: <defaults>
</compile_context>

<pallas_src>
import math
import functools

import jax
import jax.numpy as jnp
from jax.experimental import pallas as pl
from jax.experimental.pallas import tpu as pltpu


_VMEM_LIMIT = 64 * 1024 * 1024  # raise above v5e's 16 MiB scoped default


# ----------------------------------------------------------------------------
# Kernels
# ----------------------------------------------------------------------------

def _i3d_stub_kernel(x_ref, w_ref, b_ref, o_ref, *, inv_hw):
    """One (segment, batch-element) per grid step.

    x_ref: (1, C, seg_len, H*W) f32    w_ref: (C*seg_len, E) f32
    b_ref: (1, E) f32                  o_ref: (1, B, E) f32 (resident over b)
    """
    b_idx = pl.program_id(1)                       # batch element (inner axis)
    _, C, T, HW = x_ref.shape
    # (C, T, HW) -> (C*T, HW): major-dim merge, no relayout.
    x3 = x_ref[0].reshape(C * T, HW)
    # Spatial sum on the MXU (contract HW against a ones column); scale in f32.
    pooled = jnp.dot(x3.astype(jnp.bfloat16),
                     jnp.ones((HW, 1), jnp.bfloat16),
                     preferred_element_type=jnp.float32) * inv_hw   # (C*T, 1)
    # Project pooled segment to the embedding.  One broadcast-multiply + one
    # sublane reduce over C*T (=48) rows -- kept off the MXU only to avoid a
    # transposed-LHS matmul; this is negligible next to the HW reduction above.
    feat = jnp.sum(pooled * w_ref[...], axis=0, keepdims=True) + b_ref[...]
    # Output block (1, B, E) stays resident across the inner batch axis; each
    # step fills its own row, the full dense block is written back when the
    # segment index changes.
    o_ref[0, pl.ds(b_idx, 1), :] = feat


def _encoder_layer_kernel(x_ref, wqkv_ref, bqkv_ref, wo_ref, bo_ref,
                          ln1g_ref, ln1b_ref, w1_ref, b1_ref, w2_ref, b2_ref,
                          ln2g_ref, ln2b_ref, o_ref, *, nhead, nb, slab):
    """Fused nn.TransformerEncoderLayer (post-norm, ReLU, eval-mode dropout).

    x_ref/o_ref: (nb*slab, E) f32 -- nb independent attention slabs of `slab`
    rows each.  Weights bf16, biases / LN params f32.
    """
    x = x_ref[...]                                  # (M, E) f32, M = nb*slab
    M, E = x.shape
    dh = E // nhead

    # --- fused QKV projection: one wide MXU pass with M = nb*slab rows ---
    qkv = jnp.dot(x.astype(jnp.bfloat16), wqkv_ref[...],
                  preferred_element_type=jnp.float32) + bqkv_ref[...]
    # 1/sqrt(dh) is pre-folded into the q columns of wqkv/bqkv at init time.
    qb = qkv[:, :E].astype(jnp.bfloat16)
    kb = qkv[:, E:2 * E].astype(jnp.bfloat16)
    vb = qkv[:, 2 * E:].astype(jnp.bfloat16)

    # --- multi-head self-attention ---
    # Scores contract the dh axis directly (no XLU transpose of K); each
    # head's context goes through its (dh, E) slice of wo and is accumulated
    # into the residual (no lane concat of dh-wide head slices).
    y = x + bo_ref[...]                             # residual + out-proj bias
    for h in range(nhead):                          # static, unrolled
        c0, c1 = h * dh, (h + 1) * dh
        ctx_slabs = []
        for i in range(nb):                         # static, unrolled
            r0, r1 = i * slab, (i + 1) * slab
            qh = qb[r0:r1, c0:c1]                   # (slab, dh)
            kh = kb[r0:r1, c0:c1]                   # (slab, dh)
            vh = vb[r0:r1, c0:c1]                   # (slab, dh)
            s = jax.lax.dot_general(qh, kh, (((1,), (1,)), ((), ())),
                                    preferred_element_type=jnp.float32)
            s = s - jnp.max(s, axis=-1, keepdims=True)
            p = jnp.exp(s)
            # normalization via the EUP (denominator >= 1, approx is safe)
            p = p * pl.reciprocal(jnp.sum(p, axis=-1, keepdims=True),
                                  approx=True)
            ctx_slabs.append(jnp.dot(p.astype(jnp.bfloat16), vh,
                                     preferred_element_type=jnp.float32))
        ctx = ctx_slabs[0] if nb == 1 else jnp.concatenate(ctx_slabs, axis=0)
        y = y + jnp.dot(ctx.astype(jnp.bfloat16), wo_ref[c0:c1, :],
                        preferred_element_type=jnp.float32)        # (M, E)

    # --- add & LayerNorm 1 (f32; E is the true d_model here -- if the real
    # 400-d embedding were padded to 512 these reductions would need masking) ---
    mu = jnp.mean(y, axis=-1, keepdims=True)
    var = jnp.mean(jnp.square(y - mu), axis=-1, keepdims=True)
    h1 = (y - mu) * jax.lax.rsqrt(var + 1e-5) * ln1g_ref[...] + ln1b_ref[...]

    # --- feed-forward: (M,E)@(E,dff) -> ReLU -> (M,dff)@(dff,E) ---
    f = jnp.dot(h1.astype(jnp.bfloat16), w1_ref[...],
                preferred_element_type=jnp.float32) + b1_ref[...]
    f = jnp.maximum(f, 0.0)
    f = jnp.dot(f.astype(jnp.bfloat16), w2_ref[...],
                preferred_element_type=jnp.float32) + b2_ref[...]

    # --- add & LayerNorm 2 ---
    y2 = h1 + f
    mu2 = jnp.mean(y2, axis=-1, keepdims=True)
    var2 = jnp.mean(jnp.square(y2 - mu2), axis=-1, keepdims=True)
    o_ref[...] = ((y2 - mu2) * jax.lax.rsqrt(var2 + 1e-5)
                  * ln2g_ref[...] + ln2b_ref[...])


def _matmul_bias_kernel(x_ref, w_ref, b_ref, o_ref):
    o_ref[...] = jnp.dot(x_ref[...].astype(jnp.bfloat16), w_ref[...],
                         preferred_element_type=jnp.float32) + b_ref[...]


# ----------------------------------------------------------------------------
# Block-size pickers (trace-time Python)
# ----------------------------------------------------------------------------

def _pick_nb(n_slabs, slab):
    """Slabs per encoder grid step.

    Smallest nb dividing n_slabs whose row count nb*slab is a legal
    sublane-tiled block (multiple of 8, or the whole array) and reaches ~256
    MXU rows; smallest-first keeps the grid extent >= 2 when possible so v7x
    megacore sharding still has work for both TensorCores.
    """
    best = n_slabs
    for nb in range(1, n_slabs + 1):
        if n_slabs % nb:
            continue
        rows = nb * slab
        if rows % 8 == 0 or nb == n_slabs:
            best = nb
            if rows >= 256:
                break
    return best


def _pick_row_block(m, target=256):
    """Row tile for the final fc: ~256 rows, must divide m and be 8-aligned."""
    if m <= target:
        return m
    for rb in range(target, 0, -8):
        if m % rb == 0:
            return rb
    return m


# ----------------------------------------------------------------------------
# Pallas wrappers
# ----------------------------------------------------------------------------

def i3d_stub(x, w, b, segs, seg_len):
    """Spatial-mean-per-segment + projection.  x: (B,C,F,H,W) -> (T', B, E).

    Emits (T', B, E) directly (the layout the batch_first=False transformer
    wants), so the i3d-output transpose and the pre-encoder transpose both
    disappear.  Segment-tiled DMA keeps the per-step VMEM block small at real
    video sizes (v7x: 64 MiB VMEM).
    """
    B, C, F, H, W = x.shape
    HW = H * W
    E = w.shape[-1]
    x4 = x.reshape(B, C, F, HW)                     # contiguous reshape (free)
    kernel = functools.partial(_i3d_stub_kernel, inv_hw=1.0 / HW)
    return pl.pallas_call(
        kernel,
        out_shape=jax.ShapeDtypeStruct((segs, B, E), jnp.float32),
        grid=(segs, B),
        in_specs=[
            pl.BlockSpec((1, C, seg_len, HW), lambda s, b_: (b_, 0, s, 0)),
            pl.BlockSpec((C * seg_len, E), lambda s, b_: (0, 0)),
            pl.BlockSpec((1, E), lambda s, b_: (0, 0)),
        ],
        # same block for every b -> output stays VMEM-resident across the
        # inner batch axis and is written back once per segment (dense store).
        out_specs=pl.BlockSpec((1, B, E), lambda s, b_: (s, 0, 0)),
        compiler_params=pltpu.CompilerParams(
            dimension_semantics=("parallel", "arbitrary"),
            vmem_limit_bytes=_VMEM_LIMIT),
    )(x4, w, b)


def encoder_layer(h_flat, p, *, nhead, n_slabs, slab):
    """One fused transformer encoder layer on the flat (n_slabs*slab, E) slab."""
    M, E = h_flat.shape
    assert M == n_slabs * slab
    dff = p["w1"].shape[1]
    nb = _pick_nb(n_slabs, slab)
    rows = nb * slab
    kernel = functools.partial(_encoder_layer_kernel,
                               nhead=nhead, nb=nb, slab=slab)
    # NOTE(v7x, real sizes): add pipeline_mode=pl.Buffered(1) to the constant
    # index-map weight specs below to reclaim their second pipeline buffer.
    return pl.pallas_call(
        kernel,
        out_shape=jax.ShapeDtypeStruct((M, E), jnp.float32),
        grid=(n_slabs // nb,),
        in_specs=[
            pl.BlockSpec((rows, E), lambda n: (n, 0)),         # x
            pl.BlockSpec((E, 3 * E), lambda n: (0, 0)),        # wqkv (bf16)
            pl.BlockSpec((1, 3 * E), lambda n: (0, 0)),        # bqkv
            pl.BlockSpec((E, E), lambda n: (0, 0)),            # wo (bf16)
            pl.BlockSpec((1, E), lambda n: (0, 0)),            # bo
            pl.BlockSpec((1, E), lambda n: (0, 0)),            # ln1_g
            pl.BlockSpec((1, E), lambda n: (0, 0)),            # ln1_b
            pl.BlockSpec((E, dff), lambda n: (0, 0)),          # w1 (bf16)
            pl.BlockSpec((1, dff), lambda n: (0, 0)),          # b1
            pl.BlockSpec((dff, E), lambda n: (0, 0)),          # w2 (bf16)
            pl.BlockSpec((1, E), lambda n: (0, 0)),            # b2
            pl.BlockSpec((1, E), lambda n: (0, 0)),            # ln2_g
            pl.BlockSpec((1, E), lambda n: (0, 0)),            # ln2_b
        ],
        out_specs=pl.BlockSpec((rows, E), lambda n: (n, 0)),
        compiler_params=pltpu.CompilerParams(
            dimension_semantics=("parallel",),
            vmem_limit_bytes=_VMEM_LIMIT),
    )(h_flat,
      p["wqkv"], p["bqkv"], p["wo"], p["bo"],
      p["ln1_g"], p["ln1_b"],
      p["w1"], p["b1"], p["w2"], p["b2"],
      p["ln2_g"], p["ln2_b"])


def final_fc(x, w, b):
    """x: (M, E) f32, w: (E, Vpad) bf16, b: (1, Vpad) f32 -> (M, Vpad) f32.

    Row-tiled grid ("parallel") with the weight VMEM-resident via a constant
    index map -> pipelined HBM traffic and lane/sublane-dense stores.
    """
    M, E = x.shape
    Vp = w.shape[1]
    rb = _pick_row_block(M)
    return pl.pallas_call(
        _matmul_bias_kernel,
        out_shape=jax.ShapeDtypeStruct((M, Vp), jnp.float32),
        grid=(M // rb,),
        in_specs=[
            pl.BlockSpec((rb, E), lambda i: (i, 0)),
            pl.BlockSpec((E, Vp), lambda i: (0, 0)),
            pl.BlockSpec((1, Vp), lambda i: (0, 0)),
        ],
        out_specs=pl.BlockSpec((rb, Vp), lambda i: (i, 0)),
        compiler_params=pltpu.CompilerParams(
            dimension_semantics=("parallel",),
            vmem_limit_bytes=_VMEM_LIMIT),
    )(x, w, b)


# ----------------------------------------------------------------------------
# Full forward pass
# ----------------------------------------------------------------------------

@functools.partial(jax.jit,
                   static_argnames=("nhead", "segment_length", "vocab_size"))
def lip_reading_forward(x, params, *, nhead, segment_length, vocab_size):
    B, C, F, H, W = x.shape
    segs = F // segment_length

    # --- I3D stub: emits (T', B, E), already in the encoder's layout ---
    feats = i3d_stub(x, params["i3d_w"], params["i3d_b"], segs, segment_length)
    E = feats.shape[-1]

    # nn.TransformerEncoder with batch_first=False attends over dim0 (=B) and
    # treats dim1 (=T') as batch -> flat rows ordered t*B + b; slab t is the
    # contiguous row range [t*B, (t+1)*B).
    h = feats.reshape(segs * B, E)
    for lp in params["layers"]:
        h = encoder_layer(h, lp, nhead=nhead, n_slabs=segs, slab=B)

    # --- final fc (weights pre-padded/pre-cast in init_params) ---
    logits = final_fc(h, params["fc_w"], params["fc_b"])        # (T'*B, Vpad)
    # slice to the true vocab BEFORE transposing so only vocab-width data moves
    logits = logits.reshape(segs, B, -1)[:, :, :vocab_size]     # (T', B, V)
    return jnp.transpose(logits, (1, 0, 2))                     # (B, T', V)


# ----------------------------------------------------------------------------
# Deterministic synthetic parameters
# ----------------------------------------------------------------------------

def init_params(key, in_channels, segment_length, d_model, nhead, dff,
                num_layers, vocab_size):
    keys = iter(jax.random.split(key, 4 + num_layers * 8))

    def w(shape):
        return jax.random.normal(next(keys), shape, jnp.float32) * 0.02

    dh = d_model // nhead
    scale = 1.0 / math.sqrt(dh)
    vpad = max(128, ((vocab_size + 127) // 128) * 128)

    fc_w = w((d_model, vocab_size))
    fc_b = w((1, vocab_size))

    params = {
        # I3D stub projection (f32: used in a tiny VPU contraction per segment)
        "i3d_w": w((in_channels * segment_length, d_model)),
        "i3d_b": w((1, d_model)),
        # final fc pre-padded to a lane-dense vocab and pre-cast to bf16
        # (hoisted out of the forward pass -> no per-call HBM re-pad/cast)
        "fc_w": jnp.pad(fc_w, ((0, 0), (0, vpad - vocab_size))).astype(jnp.bfloat16),
        "fc_b": jnp.pad(fc_b, ((0, 0), (0, vpad - vocab_size))),
        "layers": [],
    }
    for _ in range(num_layers):
        wqkv = w((d_model, 3 * d_model))
        bqkv = w((1, 3 * d_model))
        # fold the 1/sqrt(dh) attention scale into the q projection (weights
        # loaded from a real PyTorch checkpoint would get the same fold)
        wqkv = wqkv.at[:, :d_model].multiply(scale)
        bqkv = bqkv.at[:, :d_model].multiply(scale)
        params["layers"].append({
            "wqkv": wqkv.astype(jnp.bfloat16),
            "bqkv": bqkv,
            "wo": w((d_model, d_model)).astype(jnp.bfloat16),
            "bo": w((1, d_model)),
            "ln1_g": jnp.ones((1, d_model), jnp.float32),
            "ln1_b": jnp.zeros((1, d_model), jnp.float32),
            "w1": w((d_model, dff)).astype(jnp.bfloat16),
            "b1": w((1, dff)),
            "w2": w((dff, d_model)).astype(jnp.bfloat16),
            "b2": w((1, d_model)),
            "ln2_g": jnp.ones((1, d_model), jnp.float32),
            "ln2_b": jnp.zeros((1, d_model), jnp.float32),
        })
    return params


# ----------------------------------------------------------------------------
# Demo
# ----------------------------------------------------------------------------

if __name__ == "__main__":
    # x: (batch, channels=3, frames, height, width); frames = 2 segments of 16.
    B, C, F, H, W = 2, 3, 32, 16, 16
    segment_length = 16
    d_model = 128      # lane-dense stand-in for the 400-d I3D embedding
    nhead = 4
    dff = 256          # lane-dense stand-in for dim_feedforward=2048
    num_layers = 6
    vocab_size = 10    # fc runs at 128 padded columns; sliced back at the end

    key = jax.random.PRNGKey(0)
    kx, kp = jax.random.split(key)
    x = jax.random.normal(kx, (B, C, F, H, W), jnp.float32)
    params = init_params(kp, C, segment_length, d_model, nhead, dff,
                         num_layers, vocab_size)

    out = lip_reading_forward(x, params, nhead=nhead,
                              segment_length=segment_length,
                              vocab_size=vocab_size)
    out = jax.block_until_ready(out)

    segs = F // segment_length
    assert out.shape == (B, segs, vocab_size), out.shape
    assert out.dtype == jnp.float32
    assert bool(jnp.all(jnp.isfinite(out)))
    print("KERNEL_OK")
</pallas_src>

<mosaic_0001>
module attributes {stable_mosaic.version = 11 : i64} {
  func.func @_matmul_bias_kernel(%arg0: i32, %arg1: memref<4x128xf32, #tpu.memory_space<vmem>>, %arg2: memref<128x128xbf16, #tpu.memory_space<vmem>>, %arg3: memref<1x128xf32, #tpu.memory_space<vmem>>, %arg4: memref<4x128xf32, #tpu.memory_space<vmem>>) attributes {dimension_semantics = [#tpu.dimension_semantics<parallel>], iteration_bounds = array<i64: 1>, scalar_prefetch = 0 : i64, scratch_operands = 0 : i64, tpu.core_type = #tpu.core_type<tc>, window_params = [{transform_indices = @transform_0, window_bounds = array<i64: 4, 128>}, {pipeline_mode = #tpu.pipeline_mode<synchronous>, transform_indices = @transform_1, window_bounds = array<i64: 128, 128>}, {pipeline_mode = #tpu.pipeline_mode<synchronous>, transform_indices = @transform_2, window_bounds = array<i64: 1, 128>}, {transform_indices = @transform_3, window_bounds = array<i64: 4, 128>}]} {
    %c0 = arith.constant 0 : index
    %c0_0 = arith.constant 0 : index
    %0 = vector.load %arg1[%c0, %c0_0] : memref<4x128xf32, #tpu.memory_space<vmem>>, vector<4x128xf32>
    %1 = arith.truncf %0 : vector<4x128xf32> to vector<4x128xbf16>
    %c0_1 = arith.constant 0 : index
    %c0_2 = arith.constant 0 : index
    %2 = vector.load %arg2[%c0_1, %c0_2] : memref<128x128xbf16, #tpu.memory_space<vmem>>, vector<128x128xbf16>
    %cst = arith.constant dense<0.000000e+00> : vector<4x128xf32>
    %3 = tpu.matmul %1, %2, %cst {dimension_numbers = #tpu.dot_dimension_numbers<[1], [0], [0], [1], [0, 0, 1, 1], [], []>} : vector<4x128xbf16>, vector<128x128xbf16>, vector<4x128xf32> -> vector<4x128xf32>
    %c0_3 = arith.constant 0 : index
    %c0_4 = arith.constant 0 : index
    %4 = vector.load %arg3[%c0_3, %c0_4] : memref<1x128xf32, #tpu.memory_space<vmem>>, vector<1x128xf32>
    %5 = vector.broadcast %4 : vector<1x128xf32> to vector<4x128xf32>
    %6 = arith.addf %3, %5 : vector<4x128xf32>
    %c0_5 = arith.constant 0 : index
    %c0_6 = arith.constant 0 : index
    %7 = vector.load %arg4[%c0_5, %c0_6] : memref<4x128xf32, #tpu.memory_space<vmem>>, vector<4x128xf32>
    tpu.vector_store %arg4[%c0_5, %c0_6], %6 {strides = array<i32>} : memref<4x128xf32, #tpu.memory_space<vmem>>, vector<4x128xf32>,
    return
  }
  func.func @transform_0(%arg0: i32) -> (i32, i32) {
    %c0_i32 = arith.constant 0 : i32
    %c0_i32_0 = arith.constant 0 : i32
    return %arg0, %c0_i32 : i32, i32
  }
  func.func @transform_1(%arg0: i32) -> (i32, i32) {
    %c0_i32 = arith.constant 0 : i32
    %c0_i32_0 = arith.constant 0 : i32
    %c0_i32_1 = arith.constant 0 : i32
    return %c0_i32, %c0_i32_0 : i32, i32
  }
  func.func @transform_2(%arg0: i32) -> (i32, i32) {
    %c0_i32 = arith.constant 0 : i32
    %c0_i32_0 = arith.constant 0 : i32
    %c0_i32_1 = arith.constant 0 : i32
    return %c0_i32, %c0_i32_0 : i32, i32
  }
  func.func @transform_3(%arg0: i32) -> (i32, i32) {
    %c0_i32 = arith.constant 0 : i32
    %c0_i32_0 = arith.constant 0 : i32
    return %arg0, %c0_i32 : i32, i32
  }
}

module attributes {stable_mosaic.version = 11 : i64} {
  func.func @_i3d_stub_kernel(%arg0: i32, %arg1: i32, %arg2: memref<1x3x16x256xf32, #tpu.memory_space<vmem>>, %arg3: memref<48x128xf32, #tpu.memory_space<vmem>>, %arg4: memref<1x128xf32, #tpu.memory_space<vmem>>, %arg5: memref<1x2x128xf32, #tpu.memory_space<vmem>>) attributes {dimension_semantics = [#tpu.dimension_semantics<parallel>, #tpu.dimension_semantics<arbitrary>], iteration_bounds = array<i64: 2, 2>, scalar_prefetch = 0 : i64, scratch_operands = 0 : i64, tpu.core_type = #tpu.core_type<tc>, window_params = [{transform_indices = @transform_0, window_bounds = array<i64: 1, 3, 16, 256>}, {pipeline_mode = #tpu.pipeline_mode<synchronous>, transform_indices = @transform_1, window_bounds = array<i64: 48, 128>}, {pipeline_mode = #tpu.pipeline_mode<synchronous>, transform_indices = @transform_2, window_bounds = array<i64: 1, 128>}, {transform_indices = @transform_3, window_bounds = array<i64: 1, 2, 128>}]} {
    %c0 = arith.constant 0 : index
    %c0_0 = arith.constant 0 : index
    %c0_1 = arith.constant 0 : index
    %c0_2 = arith.constant 0 : index
    %0 = vector.load %arg2[%c0, %c0_0, %c0_1, %c0_2] : memref<1x3x16x256xf32, #tpu.memory_space<vmem>>, vector<1x3x16x256xf32>
    %1 = vector.shape_cast %0 : vector<1x3x16x256xf32> to vector<3x16x256xf32>
    %2 = vector.shape_cast %1 : vector<3x16x256xf32> to vector<48x256xf32>
    %3 = arith.truncf %2 : vector<48x256xf32> to vector<48x256xbf16>
    %cst = arith.constant 1.000000e+00 : bf16
    %4 = vector.broadcast %cst : bf16 to vector<256x1xbf16>
    %cst_3 = arith.constant dense<0.000000e+00> : vector<48x1xf32>
    %5 = tpu.matmul %3, %4, %cst_3 {dimension_numbers = #tpu.dot_dimension_numbers<[1], [0], [0], [1], [0, 0, 1, 1], [], []>} : vector<48x256xbf16>, vector<256x1xbf16>, vector<48x1xf32> -> vector<48x1xf32>
    %cst_4 = arith.constant 3.906250e-03 : f32
    %6 = vector.broadcast %cst_4 : f32 to vector<48x1xf32>
    %7 = arith.mulf %5, %6 : vector<48x1xf32>
    %c0_5 = arith.constant 0 : index
    %c0_6 = arith.constant 0 : index
    %8 = vector.load %arg3[%c0_5, %c0_6] : memref<48x128xf32, #tpu.memory_space<vmem>>, vector<48x128xf32>
    %9 = vector.broadcast %7 : vector<48x1xf32> to vector<48x128xf32>
    %10 = arith.mulf %9, %8 : vector<48x128xf32>
    %cst_7 = arith.constant dense<0.000000e+00> : vector<128xf32>
    %11 = vector.multi_reduction <add>, %10, %cst_7 [0] : vector<48x128xf32> to vector<128xf32>
    %12 = vector.shape_cast %11 : vector<128xf32> to vector<1x128xf32>
    %c0_8 = arith.constant 0 : index
    %c0_9 = arith.constant 0 : index
    %13 = vector.load %arg4[%c0_8, %c0_9] : memref<1x128xf32, #tpu.memory_space<vmem>>, vector<1x128xf32>
    %14 = arith.addf %12, %13 : vector<1x128xf32>
    %c0_10 = arith.constant 0 : index
    %15 = arith.index_cast %arg1 : i32 to index
    %c0_11 = arith.constant 0 : index
    %16 = vector.load %arg5[%c0_10, %15, %c0_11] : memref<1x2x128xf32, #tpu.memory_space<vmem>>, vector<1x1x128xf32>
    %17 = vector.shape_cast %16 : vector<1x1x128xf32> to vector<1x128xf32>
    %18 = vector.shape_cast %14 : vector<1x128xf32> to vector<1x1x128xf32>
    tpu.vector_store %arg5[%c0_10, %15, %c0_11], %18 {strides = array<i32>} : memref<1x2x128xf32, #tpu.memory_space<vmem>>, vector<1x1x128xf32>,
    return
  }
  func.func @transform_0(%arg0: i32, %arg1: i32) -> (i32, i32, i32, i32) {
    %c0_i32 = arith.constant 0 : i32
    %c0_i32_0 = arith.constant 0 : i32
    %c0_i32_1 = arith.constant 0 : i32
    return %arg1, %c0_i32, %arg0, %c0_i32_0 : i32, i32, i32, i32
  }
  func.func @transform_1(%arg0: i32, %arg1: i32) -> (i32, i32) {
    %c0_i32 = arith.constant 0 : i32
    %c0_i32_0 = arith.constant 0 : i32
    %c0_i32_1 = arith.constant 0 : i32
    return %c0_i32, %c0_i32_0 : i32, i32
  }
  func.func @transform_2(%arg0: i32, %arg1: i32) -> (i32, i32) {
    %c0_i32 = arith.constant 0 : i32
    %c0_i32_0 = arith.constant 0 : i32
    %c0_i32_1 = arith.constant 0 : i32
    return %c0_i32, %c0_i32_0 : i32, i32
  }
  func.func @transform_3(%arg0: i32, %arg1: i32) -> (i32, i32, i32) {
    %c0_i32 = arith.constant 0 : i32
    %c0_i32_0 = arith.constant 0 : i32
    %c0_i32_1 = arith.constant 0 : i32
    return %arg0, %c0_i32, %c0_i32_0 : i32, i32, i32
  }
}

module attributes {stable_mosaic.version = 11 : i64} {
  func.func @_encoder_layer_kernel(%arg0: i32, %arg1: memref<4x128xf32, #tpu.memory_space<vmem>>, %arg2: memref<128x384xbf16, #tpu.memory_space<vmem>>, %arg3: memref<1x384xf32, #tpu.memory_space<vmem>>, %arg4: memref<128x128xbf16, #tpu.memory_space<vmem>>, %arg5: memref<1x128xf32, #tpu.memory_space<vmem>>, %arg6: memref<1x128xf32, #tpu.memory_space<vmem>>, %arg7: memref<1x128xf32, #tpu.memory_space<vmem>>, %arg8: memref<128x256xbf16, #tpu.memory_space<vmem>>, %arg9: memref<1x256xf32, #tpu.memory_space<vmem>>, %arg10: memref<256x128xbf16, #tpu.memory_space<vmem>>, %arg11: memref<1x128xf32, #tpu.memory_space<vmem>>, %arg12: memref<1x128xf32, #tpu.memory_space<vmem>>, %arg13: memref<1x128xf32, #tpu.memory_space<vmem>>, %arg14: memref<4x128xf32, #tpu.memory_space<vmem>>) attributes {dimension_semantics = [#tpu.dimension_semantics<parallel>], iteration_bounds = array<i64: 1>, scalar_prefetch = 0 : i64, scratch_operands = 0 : i64, tpu.core_type = #tpu.core_type<tc>, window_params = [{transform_indices = @transform_0, window_bounds = array<i64: 4, 128>}, {pipeline_mode = #tpu.pipeline_mode<synchronous>, transform_indices = @transform_1, window_bounds = array<i64: 128, 384>}, {pipeline_mode = #tpu.pipeline_mode<synchronous>, transform_indices = @transform_2, window_bounds = array<i64: 1, 384>}, {pipeline_mode = #tpu.pipeline_mode<synchronous>, transform_indices = @transform_3, window_bounds = array<i64: 128, 128>}, {pipeline_mode = #tpu.pipeline_mode<synchronous>, transform_indices = @transform_4, window_bounds = array<i64: 1, 128>}, {pipeline_mode = #tpu.pipeline_mode<synchronous>, transform_indices = @transform_5, window_bounds = array<i64: 1, 128>}, {pipeline_mode = #tpu.pipeline_mode<synchronous>, transform_indices = @transform_6, window_bounds = array<i64: 1, 128>}, {pipeline_mode = #tpu.pipeline_mode<synchronous>, transform_indices = @transform_7, window_bounds = array<i64: 128, 256>}, {pipeline_mode = #tpu.pipeline_mode<synchronous>, transform_indices = @transform_8, window_bounds = array<i64: 1, 256>}, {pipeline_mode = #tpu.pipeline_mode<synchronous>, transform_indices = @transform_9, window_bounds = array<i64: 256, 128>}, {pipeline_mode = #tpu.pipeline_mode<synchronous>, transform_indices = @transform_10, window_bounds = array<i64: 1, 128>}, {pipeline_mode = #tpu.pipeline_mode<synchronous>, transform_indices = @transform_11, window_bounds = array<i64: 1, 128>}, {pipeline_mode = #tpu.pipeline_mode<synchronous>, transform_indices = @transform_12, window_bounds = array<i64: 1, 128>}, {transform_indices = @transform_13, window_bounds = array<i64: 4, 128>}]} {
    %c0 = arith.constant 0 : index
    %c0_0 = arith.constant 0 : index
    %0 = vector.load %arg1[%c0, %c0_0] : memref<4x128xf32, #tpu.memory_space<vmem>>, vector<4x128xf32>
    %1 = arith.truncf %0 : vector<4x128xf32> to vector<4x128xbf16>
    %c0_1 = arith.constant 0 : index
    %c0_2 = arith.constant 0 : index
    %2 = vector.load %arg2[%c0_1, %c0_2] : memref<128x384xbf16, #tpu.memory_space<vmem>>, vector<128x384xbf16>
    %cst = arith.constant dense<0.000000e+00> : vector<4x384xf32>
    %3 = tpu.matmul %1, %2, %cst {dimension_numbers = #tpu.dot_dimension_numbers<[1], [0], [0], [1], [0, 0, 1, 1], [], []>} : vector<4x128xbf16>, vector<128x384xbf16>, vector<4x384xf32> -> vector<4x384xf32>
    %c0_3 = arith.constant 0 : index
    %c0_4 = arith.constant 0 : index
    %4 = vector.load %arg3[%c0_3, %c0_4] : memref<1x384xf32, #tpu.memory_space<vmem>>, vector<1x384xf32>
    %5 = vector.broadcast %4 : vector<1x384xf32> to vector<4x384xf32>
    %6 = arith.addf %3, %5 : vector<4x384xf32>
    %7 = vector.extract_strided_slice %6 {offsets = [0, 0], sizes = [4, 128], strides = [1, 1]} : vector<4x384xf32> to vector<4x128xf32>
    %8 = arith.truncf %7 : vector<4x128xf32> to vector<4x128xbf16>
    %9 = vector.extract_strided_slice %6 {offsets = [0, 128], sizes = [4, 128], strides = [1, 1]} : vector<4x384xf32> to vector<4x128xf32>
    %10 = arith.truncf %9 : vector<4x128xf32> to vector<4x128xbf16>
    %11 = vector.extract_strided_slice %6 {offsets = [0, 256], sizes = [4, 128], strides = [1, 1]} : vector<4x384xf32> to vector<4x128xf32>
    %12 = arith.truncf %11 : vector<4x128xf32> to vector<4x128xbf16>
    %c0_5 = arith.constant 0 : index
    %c0_6 = arith.constant 0 : index
    %13 = vector.load %arg5[%c0_5, %c0_6] : memref<1x128xf32, #tpu.memory_space<vmem>>, vector<1x128xf32>
    %14 = vector.broadcast %13 : vector<1x128xf32> to vector<4x128xf32>
    %15 = arith.addf %0, %14 : vector<4x128xf32>
    %16 = vector.extract_strided_slice %8 {offsets = [0, 0], sizes = [2, 32], strides = [1, 1]} : vector<4x128xbf16> to vector<2x32xbf16>
    %17 = vector.extract_strided_slice %10 {offsets = [0, 0], sizes = [2, 32], strides = [1, 1]} : vector<4x128xbf16> to vector<2x32xbf16>
    %18 = vector.extract_strided_slice %12 {offsets = [0, 0], sizes = [2, 32], strides = [1, 1]} : vector<4x128xbf16> to vector<2x32xbf16>
    %cst_7 = arith.constant dense<0.000000e+00> : vector<2x2xf32>
    %19 = tpu.matmul %16, %17, %cst_7 {dimension_numbers = #tpu.dot_dimension_numbers<[1], [1], [0], [0], [0, 0, 1, 0], [], []>} : vector<2x32xbf16>, vector<2x32xbf16>, vector<2x2xf32> -> vector<2x2xf32>
    %cst_8 = arith.constant dense<0xFF800000> : vector<2xf32>
    %20 = vector.multi_reduction <maximumf>, %19, %cst_8 [1] : vector<2x2xf32> to vector<2xf32>
    %21 = vector.shape_cast %20 : vector<2xf32> to vector<2x1xf32>
    %22 = vector.broadcast %21 : vector<2x1xf32> to vector<2x2xf32>
    %23 = arith.subf %19, %22 : vector<2x2xf32>
    %24 = math.exp %23 : vector<2x2xf32>
    %cst_9 = arith.constant dense<0.000000e+00> : vector<2xf32>
    %25 = vector.multi_reduction <add>, %24, %cst_9 [1] : vector<2x2xf32> to vector<2xf32>
    %26 = vector.shape_cast %25 : vector<2xf32> to vector<2x1xf32>
    %27 = tpu.reciprocal %26 {approx = true} : vector<2x1xf32> -> vector<2x1xf32>
    %28 = vector.broadcast %27 : vector<2x1xf32> to vector<2x2xf32>
    %29 = arith.mulf %24, %28 : vector<2x2xf32>
    %30 = arith.truncf %29 : vector<2x2xf32> to vector<2x2xbf16>
    %cst_10 = arith.constant dense<0.000000e+00> : vector<2x32xf32>
    %31 = tpu.matmul %30, %18, %cst_10 {dimension_numbers = #tpu.dot_dimension_numbers<[1], [0], [0], [1], [0, 0, 1, 1], [], []>} : vector<2x2xbf16>, vector<2x32xbf16>, vector<2x32xf32> -> vector<2x32xf32>
    %32 = vector.extract_strided_slice %8 {offsets = [2, 0], sizes = [2, 32], strides = [1, 1]} : vector<4x128xbf16> to vector<2x32xbf16>
    %33 = vector.extract_strided_slice %10 {offsets = [2, 0], sizes = [2, 32], strides = [1, 1]} : vector<4x128xbf16> to vector<2x32xbf16>
    %34 = vector.extract_strided_slice %12 {offsets = [2, 0], sizes = [2, 32], strides = [1, 1]} : vector<4x128xbf16> to vector<2x32xbf16>
    %cst_11 = arith.constant dense<0.000000e+00> : vector<2x2xf32>
    %35 = tpu.matmul %32, %33, %cst_11 {dimension_numbers = #tpu.dot_dimension_numbers<[1], [1], [0], [0], [0, 0, 1, 0], [], []>} : vector<2x32xbf16>, vector<2x32xbf16>, vector<2x2xf32> -> vector<2x2xf32>
    %cst_12 = arith.constant dense<0xFF800000> : vector<2xf32>
    %36 = vector.multi_reduction <maximumf>, %35, %cst_12 [1] : vector<2x2xf32> to vector<2xf32>
    %37 = vector.shape_cast %36 : vector<2xf32> to vector<2x1xf32>
    %38 = vector.broadcast %37 : vector<2x1xf32> to vector<2x2xf32>
    %39 = arith.subf %35, %38 : vector<2x2xf32>
    %40 = math.exp %39 : vector<2x2xf32>
    %cst_13 = arith.constant dense<0.000000e+00> : vector<2xf32>
    %41 = vector.multi_reduction <add>, %40, %cst_13 [1] : vector<2x2xf32> to vector<2xf32>
    %42 = vector.shape_cast %41 : vector<2xf32> to vector<2x1xf32>
    %43 = tpu.reciprocal %42 {approx = true} : vector<2x1xf32> -> vector<2x1xf32>
    %44 = vector.broadcast %43 : vector<2x1xf32> to vector<2x2xf32>
    %45 = arith.mulf %40, %44 : vector<2x2xf32>
    %46 = arith.truncf %45 : vector<2x2xf32> to vector<2x2xbf16>
    %cst_14 = arith.constant dense<0.000000e+00> : vector<2x32xf32>
    %47 = tpu.matmul %46, %34, %cst_14 {dimension_numbers = #tpu.dot_dimension_numbers<[1], [0], [0], [1], [0, 0, 1, 1], [], []>} : vector<2x2xbf16>, vector<2x32xbf16>, vector<2x32xf32> -> vector<2x32xf32>
    %48 = tpu.concatenate %31, %47 in 0 : vector<2x32xf32>, vector<2x32xf32> -> vector<4x32xf32>
    %49 = arith.truncf %48 : vector<4x32xf32> to vector<4x32xbf16>
    %c0_15 = arith.constant 0 : index
    %c0_16 = arith.constant 0 : index
    %50 = vector.load %arg4[%c0_15, %c0_16] : memref<128x128xbf16, #tpu.memory_space<vmem>>, vector<32x128xbf16>
    %cst_17 = arith.constant dense<0.000000e+00> : vector<4x128xf32>
    %51 = tpu.matmul %49, %50, %cst_17 {dimension_numbers = #tpu.dot_dimension_numbers<[1], [0], [0], [1], [0, 0, 1, 1], [], []>} : vector<4x32xbf16>, vector<32x128xbf16>, vector<4x128xf32> -> vector<4x128xf32>
    %52 = arith.addf %15, %51 : vector<4x128xf32>
    %53 = vector.extract_strided_slice %8 {offsets = [0, 32], sizes = [2, 32], strides = [1, 1]} : vector<4x128xbf16> to vector<2x32xbf16>
    %54 = vector.extract_strided_slice %10 {offsets = [0, 32], sizes = [2, 32], strides = [1, 1]} : vector<4x128xbf16> to vector<2x32xbf16>
    %55 = vector.extract_strided_slice %12 {offsets = [0, 32], sizes = [2, 32], strides = [1, 1]} : vector<4x128xbf16> to vector<2x32xbf16>
    %cst_18 = arith.constant dense<0.000000e+00> : vector<2x2xf32>
    %56 = tpu.matmul %53, %54, %cst_18 {dimension_numbers = #tpu.dot_dimension_numbers<[1], [1], [0], [0], [0, 0, 1, 0], [], []>} : vector<2x32xbf16>, vector<2x32xbf16>, vector<2x2xf32> -> vector<2x2xf32>
    %cst_19 = arith.constant dense<0xFF800000> : vector<2xf32>
    %57 = vector.multi_reduction <maximumf>, %56, %cst_19 [1] : vector<2x2xf32> to vector<2xf32>
    %58 = vector.shape_cast %57 : vector<2xf32> to vector<2x1xf32>
    %59 = vector.broadcast %58 : vector<2x1xf32> to vector<2x2xf32>
    %60 = arith.subf %56, %59 : vector<2x2xf32>
    %61 = math.exp %60 : vector<2x2xf32>
    %cst_20 = arith.constant dense<0.000000e+00> : vector<2xf32>
    %62 = vector.multi_reduction <add>, %61, %cst_20 [1] : vector<2x2xf32> to vector<2xf32>
    %63 = vector.shape_cast %62 : vector<2xf32> to vector<2x1xf32>
    %64 = tpu.reciprocal %63 {approx = true} : vector<2x1xf32> -> vector<2x1xf32>
    %65 = vector.broadcast %64 : vector<2x1xf32> to vector<2x2xf32>
    %66 = arith.mulf %61, %65 : vector<2x2xf32>
    %67 = arith.truncf %66 : vector<2x2xf32> to vector<2x2xbf16>
    %cst_21 = arith.constant dense<0.000000e+00> : vector<2x32xf32>
    %68 = tpu.matmul %67, %55, %cst_21 {dimension_numbers = #tpu.dot_dimension_numbers<[1], [0], [0], [1], [0, 0, 1, 1], [], []>} : vector<2x2xbf16>, vector<2x32xbf16>, vector<2x32xf32> -> vector<2x32xf32>
    %69 = vector.extract_strided_slice %8 {offsets = [2, 32], sizes = [2, 32], strides = [1, 1]} : vector<4x128xbf16> to vector<2x32xbf16>
    %70 = vector.extract_strided_slice %10 {offsets = [2, 32], sizes = [2, 32], strides = [1, 1]} : vector<4x128xbf16> to vector<2x32xbf16>
    %71 = vector.extract_strided_slice %12 {offsets = [2, 32], sizes = [2, 32], strides = [1, 1]} : vector<4x128xbf16> to vector<2x32xbf16>
    %cst_22 = arith.constant dense<0.000000e+00> : vector<2x2xf32>
    %72 = tpu.matmul %69, %70, %cst_22 {dimension_numbers = #tpu.dot_dimension_numbers<[1], [1], [0], [0], [0, 0, 1, 0], [], []>} : vector<2x32xbf16>, vector<2x32xbf16>, vector<2x2xf32> -> vector<2x2xf32>
    %cst_23 = arith.constant dense<0xFF800000> : vector<2xf32>
    %73 = vector.multi_reduction <maximumf>, %72, %cst_23 [1] : vector<2x2xf32> to vector<2xf32>
    %74 = vector.shape_cast %73 : vector<2xf32> to vector<2x1xf32>
    %75 = vector.broadcast %74 : vector<2x1xf32> to vector<2x2xf32>
    %76 = arith.subf %72, %75 : vector<2x2xf32>
    %77 = math.exp %76 : vector<2x2xf32>
    %cst_24 = arith.constant dense<0.000000e+00> : vector<2xf32>
    %78 = vector.multi_reduction <add>, %77, %cst_24 [1] : vector<2x2xf32> to vector<2xf32>
    %79 = vector.shape_cast %78 : vector<2xf32> to vector<2x1xf32>
    %80 = tpu.reciprocal %79 {approx = true} : vector<2x1xf32> -> vector<2x1xf32>
    %81 = vector.broadcast %80 : vector<2x1xf32> to vector<2x2xf32>
    %82 = arith.mulf %77, %81 : vector<2x2xf32>
    %83 = arith.truncf %82 : vector<2x2xf32> to vector<2x2xbf16>
    %cst_25 = arith.constant dense<0.000000e+00> : vector<2x32xf32>
    %84 = tpu.matmul %83, %71, %cst_25 {dimension_numbers = #tpu.dot_dimension_numbers<[1], [0], [0], [1], [0, 0, 1, 1], [], []>} : vector<2x2xbf16>, vector<2x32xbf16>, vector<2x32xf32> -> vector<2x32xf32>
    %85 = tpu.concatenate %68, %84 in 0 : vector<2x32xf32>, vector<2x32xf32> -> vector<4x32xf32>
    %86 = arith.truncf %85 : vector<4x32xf32> to vector<4x32xbf16>
    %c32 = arith.constant 32 : index
    %c0_26 = arith.constant 0 : index
    %87 = vector.load %arg4[%c32, %c0_26] : memref<128x128xbf16, #tpu.memory_space<vmem>>, vector<32x128xbf16>
    %cst_27 = arith.constant dense<0.000000e+00> : vector<4x128xf32>
    %88 = tpu.matmul %86, %87, %cst_27 {dimension_numbers = #tpu.dot_dimension_numbers<[1], [0], [0], [1], [0, 0, 1, 1], [], []>} : vector<4x32xbf16>, vector<32x128xbf16>, vector<4x128xf32> -> vector<4x128xf32>
    %89 = arith.addf %52, %88 : vector<4x128xf32>
    %90 = vector.extract_strided_slice %8 {offsets = [0, 64], sizes = [2, 32], strides = [1, 1]} : vector<4x128xbf16> to vector<2x32xbf16>
    %91 = vector.extract_strided_slice %10 {offsets = [0, 64], sizes = [2, 32], strides = [1, 1]} : vector<4x128xbf16> to vector<2x32xbf16>
    %92 = vector.extract_strided_slice %12 {offsets = [0, 64], sizes = [2, 32], strides = [1, 1]} : vector<4x128xbf16> to vector<2x32xbf16>
    %cst_28 = arith.constant dense<0.000000e+00> : vector<2x2xf32>
    %93 = tpu.matmul %90, %91, %cst_28 {dimension_numbers = #tpu.dot_dimension_numbers<[1], [1], [0], [0], [0, 0, 1, 0], [], []>} : vector<2x32xbf16>, vector<2x32xbf16>, vector<2x2xf32> -> vector<2x2xf32>
    %cst_29 = arith.constant dense<0xFF800000> : vector<2xf32>
    %94 = vector.multi_reduction <maximumf>, %93, %cst_29 [1] : vector<2x2xf32> to vector<2xf32>
    %95 = vector.shape_cast %94 : vector<2xf32> to vector<2x1xf32>
    %96 = vector.broadcast %95 : vector<2x1xf32> to vector<2x2xf32>
    %97 = arith.subf %93, %96 : vector<2x2xf32>
    %98 = math.exp %97 : vector<2x2xf32>
    %cst_30 = arith.constant dense<0.000000e+00> : vector<2xf32>
    %99 = vector.multi_reduction <add>, %98, %cst_30 [1] : vector<2x2xf32> to vector<2xf32>
    %100 = vector.shape_cast %99 : vector<2xf32> to vector<2x1xf32>
    %101 = tpu.reciprocal %100 {approx = true} : vector<2x1xf32> -> vector<2x1xf32>
    %102 = vector.broadcast %101 : vector<2x1xf32> to vector<2x2xf32>
    %103 = arith.mulf %98, %102 : vector<2x2xf32>
    %104 = arith.truncf %103 : vector<2x2xf32> to vector<2x2xbf16>
    %cst_31 = arith.constant dense<0.000000e+00> : vector<2x32xf32>
    %105 = tpu.matmul %104, %92, %cst_31 {dimension_numbers = #tpu.dot_dimension_numbers<[1], [0], [0], [1], [0, 0, 1, 1], [], []>} : vector<2x2xbf16>, vector<2x32xbf16>, vector<2x32xf32> -> vector<2x32xf32>
    %106 = vector.extract_strided_slice %8 {offsets = [2, 64], sizes = [2, 32], strides = [1, 1]} : vector<4x128xbf16> to vector<2x32xbf16>
    %107 = vector.extract_strided_slice %10 {offsets = [2, 64], sizes = [2, 32], strides = [1, 1]} : vector<4x128xbf16> to vector<2x32xbf16>
    %108 = vector.extract_strided_slice %12 {offsets = [2, 64], sizes = [2, 32], strides = [1, 1]} : vector<4x128xbf16> to vector<2x32xbf16>
    %cst_32 = arith.constant dense<0.000000e+00> : vector<2x2xf32>
    %109 = tpu.matmul %106, %107, %cst_32 {dimension_numbers = #tpu.dot_dimension_numbers<[1], [1], [0], [0], [0, 0, 1, 0], [], []>} : vector<2x32xbf16>, vector<2x32xbf16>, vector<2x2xf32> -> vector<2x2xf32>
    %cst_33 = arith.constant dense<0xFF800000> : vector<2xf32>
    %110 = vector.multi_reduction <maximumf>, %109, %cst_33 [1] : vector<2x2xf32> to vector<2xf32>
    %111 = vector.shape_cast %110 : vector<2xf32> to vector<2x1xf32>
    %112 = vector.broadcast %111 : vector<2x1xf32> to vector<2x2xf32>
    %113 = arith.subf %109, %112 : vector<2x2xf32>
    %114 = math.exp %113 : vector<2x2xf32>
    %cst_34 = arith.constant dense<0.000000e+00> : vector<2xf32>
    %115 = vector.multi_reduction <add>, %114, %cst_34 [1] : vector<2x2xf32> to vector<2xf32>
    %116 = vector.shape_cast %115 : vector<2xf32> to vector<2x1xf32>
    %117 = tpu.reciprocal %116 {approx = true} : vector<2x1xf32> -> vector<2x1xf32>
    %118 = vector.broadcast %117 : vector<2x1xf32> to vector<2x2xf32>
    %119 = arith.mulf %114, %118 : vector<2x2xf32>
    %120 = arith.truncf %119 : vector<2x2xf32> to vector<2x2xbf16>
    %cst_35 = arith.constant dense<0.000000e+00> : vector<2x32xf32>
    %121 = tpu.matmul %120, %108, %cst_35 {dimension_numbers = #tpu.dot_dimension_numbers<[1], [0], [0], [1], [0, 0, 1, 1], [], []>} : vector<2x2xbf16>, vector<2x32xbf16>, vector<2x32xf32> -> vector<2x32xf32>
    %122 = tpu.concatenate %105, %121 in 0 : vector<2x32xf32>, vector<2x32xf32> -> vector<4x32xf32>
    %123 = arith.truncf %122 : vector<4x32xf32> to vector<4x32xbf16>
    %c64 = arith.constant 64 : index
    %c0_36 = arith.constant 0 : index
    %124 = vector.load %arg4[%c64, %c0_36] : memref<128x128xbf16, #tpu.memory_space<vmem>>, vector<32x128xbf16>
    %cst_37 = arith.constant dense<0.000000e+00> : vector<4x128xf32>
    %125 = tpu.matmul %123, %124, %cst_37 {dimension_numbers = #tpu.dot_dimension_numbers<[1], [0], [0], [1], [0, 0, 1, 1], [], []>} : vector<4x32xbf16>, vector<32x128xbf16>, vector<4x128xf32> -> vector<4x128xf32>
    %126 = arith.addf %89, %125 : vector<4x128xf32>
    %127 = vector.extract_strided_slice %8 {offsets = [0, 96], sizes = [2, 32], strides = [1, 1]} : vector<4x128xbf16> to vector<2x32xbf16>
    %128 = vector.extract_strided_slice %10 {offsets = [0, 96], sizes = [2, 32], strides = [1, 1]} : vector<4x128xbf16> to vector<2x32xbf16>
    %129 = vector.extract_strided_slice %12 {offsets = [0, 96], sizes = [2, 32], strides = [1, 1]} : vector<4x128xbf16> to vector<2x32xbf16>
    %cst_38 = arith.constant dense<0.000000e+00> : vector<2x2xf32>
    %130 = tpu.matmul %127, %128, %cst_38 {dimension_numbers = #tpu.dot_dimension_numbers<[1], [1], [0], [0], [0, 0, 1, 0], [], []>} : vector<2x32xbf16>, vector<2x32xbf16>, vector<2x2xf32> -> vector<2x2xf32>
    %cst_39 = arith.constant dense<0xFF800000> : vector<2xf32>
    %131 = vector.multi_reduction <maximumf>, %130, %cst_39 [1] : vector<2x2xf32> to vector<2xf32>
    %132 = vector.shape_cast %131 : vector<2xf32> to vector<2x1xf32>
    %133 = vector.broadcast %132 : vector<2x1xf32> to vector<2x2xf32>
    %134 = arith.subf %130, %133 : vector<2x2xf32>
    %135 = math.exp %134 : vector<2x2xf32>
    %cst_40 = arith.constant dense<0.000000e+00> : vector<2xf32>
    %136 = vector.multi_reduction <add>, %135, %cst_40 [1] : vector<2x2xf32> to vector<2xf32>
    %137 = vector.shape_cast %136 : vector<2xf32> to vector<2x1xf32>
    %138 = tpu.reciprocal %137 {approx = true} : vector<2x1xf32> -> vector<2x1xf32>
    %139 = vector.broadcast %138 : vector<2x1xf32> to vector<2x2xf32>
    %140 = arith.mulf %135, %139 : vector<2x2xf32>
    %141 = arith.truncf %140 : vector<2x2xf32> to vector<2x2xbf16>
    %cst_41 = arith.constant dense<0.000000e+00> : vector<2x32xf32>
    %142 = tpu.matmul %141, %129, %cst_41 {dimension_numbers = #tpu.dot_dimension_numbers<[1], [0], [0], [1], [0, 0, 1, 1], [], []>} : vector<2x2xbf16>, vector<2x32xbf16>, vector<2x32xf32> -> vector<2x32xf32>
    %143 = vector.extract_strided_slice %8 {offsets = [2, 96], sizes = [2, 32], strides = [1, 1]} : vector<4x128xbf16> to vector<2x32xbf16>
    %144 = vector.extract_strided_slice %10 {offsets = [2, 96], sizes = [2, 32], strides = [1, 1]} : vector<4x128xbf16> to vector<2x32xbf16>
    %145 = vector.extract_strided_slice %12 {offsets = [2, 96], sizes = [2, 32], strides = [1, 1]} : vector<4x128xbf16> to vector<2x32xbf16>
    %cst_42 = arith.constant dense<0.000000e+00> : vector<2x2xf32>
    %146 = tpu.matmul %143, %144, %cst_42 {dimension_numbers = #tpu.dot_dimension_numbers<[1], [1], [0], [0], [0, 0, 1, 0], [], []>} : vector<2x32xbf16>, vector<2x32xbf16>, vector<2x2xf32> -> vector<2x2xf32>
    %cst_43 = arith.constant dense<0xFF800000> : vector<2xf32>
    %147 = vector.multi_reduction <maximumf>, %146, %cst_43 [1] : vector<2x2xf32> to vector<2xf32>
    %148 = vector.shape_cast %147 : vector<2xf32> to vector<2x1xf32>
    %149 = vector.broadcast %148 : vector<2x1xf32> to vector<2x2xf32>
    %150 = arith.subf %146, %149 : vector<2x2xf32>
    %151 = math.exp %150 : vector<2x2xf32>
    %cst_44 = arith.constant dense<0.000000e+00> : vector<2xf32>
    %152 = vector.multi_reduction <add>, %151, %cst_44 [1] : vector<2x2xf32> to vector<2xf32>
    %153 = vector.shape_cast %152 : vector<2xf32> to vector<2x1xf32>
    %154 = tpu.reciprocal %153 {approx = true} : vector<2x1xf32> -> vector<2x1xf32>
    %155 = vector.broadcast %154 : vector<2x1xf32> to vector<2x2xf32>
    %156 = arith.mulf %151, %155 : vector<2x2xf32>
    %157 = arith.truncf %156 : vector<2x2xf32> to vector<2x2xbf16>
    %cst_45 = arith.constant dense<0.000000e+00> : vector<2x32xf32>
    %158 = tpu.matmul %157, %145, %cst_45 {dimension_numbers = #tpu.dot_dimension_numbers<[1], [0], [0], [1], [0, 0, 1, 1], [], []>} : vector<2x2xbf16>, vector<2x32xbf16>, vector<2x32xf32> -> vector<2x32xf32>
    %159 = tpu.concatenate %142, %158 in 0 : vector<2x32xf32>, vector<2x32xf32> -> vector<4x32xf32>
    %160 = arith.truncf %159 : vector<4x32xf32> to vector<4x32xbf16>
    %c96 = arith.constant 96 : index
    %c0_46 = arith.constant 0 : index
    %161 = vector.load %arg4[%c96, %c0_46] : memref<128x128xbf16, #tpu.memory_space<vmem>>, vector<32x128xbf16>
    %cst_47 = arith.constant dense<0.000000e+00> : vector<4x128xf32>
    %162 = tpu.matmul %160, %161, %cst_47 {dimension_numbers = #tpu.dot_dimension_numbers<[1], [0], [0], [1], [0, 0, 1, 1], [], []>} : vector<4x32xbf16>, vector<32x128xbf16>, vector<4x128xf32> -> vector<4x128xf32>
    %163 = arith.addf %126, %162 : vector<4x128xf32>
    %cst_48 = arith.constant dense<0.000000e+00> : vector<4xf32>
    %164 = vector.multi_reduction <add>, %163, %cst_48 [1] : vector<4x128xf32> to vector<4xf32>
    %165 = vector.shape_cast %164 : vector<4xf32> to vector<4x1xf32>
    %cst_49 = arith.constant 1.280000e+02 : f32
    %166 = vector.broadcast %cst_49 : f32 to vector<4x1xf32>
    %167 = arith.divf %165, %166 : vector<4x1xf32>
    %168 = vector.broadcast %167 : vector<4x1xf32> to vector<4x128xf32>
    %169 = arith.subf %163, %168 : vector<4x128xf32>
    %170 = arith.mulf %169, %169 : vector<4x128xf32>
    %cst_50 = arith.constant dense<0.000000e+00> : vector<4xf32>
    %171 = vector.multi_reduction <add>, %170, %cst_50 [1] : vector<4x128xf32> to vector<4xf32>
    %172 = vector.shape_cast %171 : vector<4xf32> to vector<4x1xf32>
    %cst_51 = arith.constant 1.280000e+02 : f32
    %173 = vector.broadcast %cst_51 : f32 to vector<4x1xf32>
    %174 = arith.divf %172, %173 : vector<4x1xf32>
    %175 = vector.broadcast %167 : vector<4x1xf32> to vector<4x128xf32>
    %176 = arith.subf %163, %175 : vector<4x128xf32>
    %cst_52 = arith.constant 9.99999974E-6 : f32
    %177 = vector.broadcast %cst_52 : f32 to vector<4x1xf32>
    %178 = arith.addf %174, %177 : vector<4x1xf32>
    %179 = math.rsqrt %178 : vector<4x1xf32>
    %180 = vector.broadcast %179 : vector<4x1xf32> to vector<4x128xf32>
    %181 = arith.mulf %176, %180 : vector<4x128xf32>
    %c0_53 = arith.constant 0 : index
    %c0_54 = arith.constant 0 : index
    %182 = vector.load %arg6[%c0_53, %c0_54] : memref<1x128xf32, #tpu.memory_space<vmem>>, vector<1x128xf32>
    %183 = vector.broadcast %182 : vector<1x128xf32> to vector<4x128xf32>
    %184 = arith.mulf %181, %183 : vector<4x128xf32>
    %c0_55 = arith.constant 0 : index
    %c0_56 = arith.constant 0 : index
    %185 = vector.load %arg7[%c0_55, %c0_56] : memref<1x128xf32, #tpu.memory_space<vmem>>, vector<1x128xf32>
    %186 = vector.broadcast %185 : vector<1x128xf32> to vector<4x128xf32>
    %187 = arith.addf %184, %186 : vector<4x128xf32>
    %188 = arith.truncf %187 : vector<4x128xf32> to vector<4x128xbf16>
    %c0_57 = arith.constant 0 : index
    %c0_58 = arith.constant 0 : index
    %189 = vector.load %arg8[%c0_57, %c0_58] : memref<128x256xbf16, #tpu.memory_space<vmem>>, vector<128x256xbf16>
    %cst_59 = arith.constant dense<0.000000e+00> : vector<4x256xf32>
    %190 = tpu.matmul %188, %189, %cst_59 {dimension_numbers = #tpu.dot_dimension_numbers<[1], [0], [0], [1], [0, 0, 1, 1], [], []>} : vector<4x128xbf16>, vector<128x256xbf16>, vector<4x256xf32> -> vector<4x256xf32>
    %c0_60 = arith.constant 0 : index
    %c0_61 = arith.constant 0 : index
    %191 = vector.load %arg9[%c0_60, %c0_61] : memref<1x256xf32, #tpu.memory_space<vmem>>, vector<1x256xf32>
    %192 = vector.broadcast %191 : vector<1x256xf32> to vector<4x256xf32>
    %193 = arith.addf %190, %192 : vector<4x256xf32>
    %cst_62 = arith.constant 0.000000e+00 : f32
    %194 = vector.broadcast %cst_62 : f32 to vector<4x256xf32>
    %195 = arith.maximumf %193, %194 : vector<4x256xf32>
    %196 = arith.truncf %195 : vector<4x256xf32> to vector<4x256xbf16>
    %c0_63 = arith.constant 0 : index
    %c0_64 = arith.constant 0 : index
    %197 = vector.load %arg10[%c0_63, %c0_64] : memref<256x128xbf16, #tpu.memory_space<vmem>>, vector<256x128xbf16>
    %cst_65 = arith.constant dense<0.000000e+00> : vector<4x128xf32>
    %198 = tpu.matmul %196, %197, %cst_65 {dimension_numbers = #tpu.dot_dimension_numbers<[1], [0], [0], [1], [0, 0, 1, 1], [], []>} : vector<4x256xbf16>, vector<256x128xbf16>, vector<4x128xf32> -> vector<4x128xf32>
    %c0_66 = arith.constant 0 : index
    %c0_67 = arith.constant 0 : index
    %199 = vector.load %arg11[%c0_66, %c0_67] : memref<1x128xf32, #tpu.memory_space<vmem>>, vector<1x128xf32>
    %200 = vector.broadcast %199 : vector<1x128xf32> to vector<4x128xf32>
    %201 = arith.addf %198, %200 : vector<4x128xf32>
    %202 = arith.addf %187, %201 : vector<4x128xf32>
    %cst_68 = arith.constant dense<0.000000e+00> : vector<4xf32>
    %203 = vector.multi_reduction <add>, %202, %cst_68 [1] : vector<4x128xf32> to vector<4xf32>
    %204 = vector.shape_cast %203 : vector<4xf32> to vector<4x1xf32>
    %cst_69 = arith.constant 1.280000e+02 : f32
    %205 = vector.broadcast %cst_69 : f32 to vector<4x1xf32>
    %206 = arith.divf %204, %205 : vector<4x1xf32>
    %207 = vector.broadcast %206 : vector<4x1xf32> to vector<4x128xf32>
    %208 = arith.subf %202, %207 : vector<4x128xf32>
    %209 = arith.mulf %208, %208 : vector<4x128xf32>
    %cst_70 = arith.constant dense<0.000000e+00> : vector<4xf32>
    %210 = vector.multi_reduction <add>, %209, %cst_70 [1] : vector<4x128xf32> to vector<4xf32>
    %211 = vector.shape_cast %210 : vector<4xf32> to vector<4x1xf32>
    %cst_71 = arith.constant 1.280000e+02 : f32
    %212 = vector.broadcast %cst_71 : f32 to vector<4x1xf32>
    %213 = arith.divf %211, %212 : vector<4x1xf32>
    %214 = vector.broadcast %206 : vector<4x1xf32> to vector<4x128xf32>
    %215 = arith.subf %202, %214 : vector<4x128xf32>
    %cst_72 = arith.constant 9.99999974E-6 : f32
    %216 = vector.broadcast %cst_72 : f32 to vector<4x1xf32>
    %217 = arith.addf %213, %216 : vector<4x1xf32>
    %218 = math.rsqrt %217 : vector<4x1xf32>
    %219 = vector.broadcast %218 : vector<4x1xf32> to vector<4x128xf32>
    %220 = arith.mulf %215, %219 : vector<4x128xf32>
    %c0_73 = arith.constant 0 : index
    %c0_74 = arith.constant 0 : index
    %221 = vector.load %arg12[%c0_73, %c0_74] : memref<1x128xf32, #tpu.memory_space<vmem>>, vector<1x128xf32>
    %222 = vector.broadcast %221 : vector<1x128xf32> to vector<4x128xf32>
    %223 = arith.mulf %220, %222 : vector<4x128xf32>
    %c0_75 = arith.constant 0 : index
    %c0_76 = arith.constant 0 : index
    %224 = vector.load %arg13[%c0_75, %c0_76] : memref<1x128xf32, #tpu.memory_space<vmem>>, vector<1x128xf32>
    %225 = vector.broadcast %224 : vector<1x128xf32> to vector<4x128xf32>
    %226 = arith.addf %223, %225 : vector<4x128xf32>
    %c0_77 = arith.constant 0 : index
    %c0_78 = arith.constant 0 : index
    %227 = vector.load %arg14[%c0_77, %c0_78] : memref<4x128xf32, #tpu.memory_space<vmem>>, vector<4x128xf32>
    tpu.vector_store %arg14[%c0_77, %c0_78], %226 {strides = array<i32>} : memref<4x128xf32, #tpu.memory_space<vmem>>, vector<4x128xf32>,
    return
  }
  func.func @transform_0(%arg0: i32) -> (i32, i32) {
    %c0_i32 = arith.constant 0 : i32
    %c0_i32_0 = arith.constant 0 : i32
    return %arg0, %c0_i32 : i32, i32
  }
  func.func @transform_1(%arg0: i32) -> (i32, i32) {
    %c0_i32 = arith.constant 0 : i32
    %c0_i32_0 = arith.constant 0 : i32
    %c0_i32_1 = arith.constant 0 : i32
    return %c0_i32, %c0_i32_0 : i32, i32
  }
  func.func @transform_2(%arg0: i32) -> (i32, i32) {
    %c0_i32 = arith.constant 0 : i32
    %c0_i32_0 = arith.constant 0 : i32
    %c0_i32_1 = arith.constant 0 : i32
    return %c0_i32, %c0_i32_0 : i32, i32
  }
  func.func @transform_3(%arg0: i32) -> (i32, i32) {
    %c0_i32 = arith.constant 0 : i32
    %c0_i32_0 = arith.constant 0 : i32
    %c0_i32_1 = arith.constant 0 : i32
    return %c0_i32, %c0_i32_0 : i32, i32
  }
  func.func @transform_4(%arg0: i32) -> (i32, i32) {
    %c0_i32 = arith.constant 0 : i32
    %c0_i32_0 = arith.constant 0 : i32
    %c0_i32_1 = arith.constant 0 : i32
    return %c0_i32, %c0_i32_0 : i32, i32
  }
  func.func @transform_5(%arg0: i32) -> (i32, i32) {
    %c0_i32 = arith.constant 0 : i32
    %c0_i32_0 = arith.constant 0 : i32
    %c0_i32_1 = arith.constant 0 : i32
    return %c0_i32, %c0_i32_0 : i32, i32
  }
  func.func @transform_6(%arg0: i32) -> (i32, i32) {
    %c0_i32 = arith.constant 0 : i32
    %c0_i32_0 = arith.constant 0 : i32
    %c0_i32_1 = arith.constant 0 : i32
    return %c0_i32, %c0_i32_0 : i32, i32
  }
  func.func @transform_7(%arg0: i32) -> (i32, i32) {
    %c0_i32 = arith.constant 0 : i32
    %c0_i32_0 = arith.constant 0 : i32
    %c0_i32_1 = arith.constant 0 : i32
    return %c0_i32, %c0_i32_0 : i32, i32
  }
  func.func @transform_8(%arg0: i32) -> (i32, i32) {
    %c0_i32 = arith.constant 0 : i32
    %c0_i32_0 = arith.constant 0 : i32
    %c0_i32_1 = arith.constant 0 : i32
    return %c0_i32, %c0_i32_0 : i32, i32
  }
  func.func @transform_9(%arg0: i32) -> (i32, i32) {
    %c0_i32 = arith.constant 0 : i32
    %c0_i32_0 = arith.constant 0 : i32
    %c0_i32_1 = arith.constant 0 : i32
    return %c0_i32, %c0_i32_0 : i32, i32
  }
  func.func @transform_10(%arg0: i32) -> (i32, i32) {
    %c0_i32 = arith.constant 0 : i32
    %c0_i32_0 = arith.constant 0 : i32
    %c0_i32_1 = arith.constant 0 : i32
    return %c0_i32, %c0_i32_0 : i32, i32
  }
  func.func @transform_11(%arg0: i32) -> (i32, i32) {
    %c0_i32 = arith.constant 0 : i32
    %c0_i32_0 = arith.constant 0 : i32
    %c0_i32_1 = arith.constant 0 : i32
    return %c0_i32, %c0_i32_0 : i32, i32
  }
  func.func @transform_12(%arg0: i32) -> (i32, i32) {
    %c0_i32 = arith.constant 0 : i32
    %c0_i32_0 = arith.constant 0 : i32
    %c0_i32_1 = arith.constant 0 : i32
    return %c0_i32, %c0_i32_0 : i32, i32
  }
  func.func @transform_13(%arg0: i32) -> (i32, i32) {
    %c0_i32 = arith.constant 0 : i32
    %c0_i32_0 = arith.constant 0 : i32
    return %arg0, %c0_i32 : i32, i32
  }
}

</mosaic_0001>

<bundles_post_ra>
// kernel: lip_reading_forward.8
= control target key start
LH: loop header
LB: loop body
LE: loop exit
PB: predicated region body
PF: predicated region fallthrough
CT: control target
= control target key end

     0   :  { %s1228_s0 = inlined_call_operand.hbm [shape: f32[2,3,32,256], index: 0, kind: input, shape index: {}]   ;;  %s1229_s1 = inlined_call_operand.hbm [shape: f32[48,128], index: 1, kind: input, shape index: {}]   ;;  %s1230_s2 = inlined_call_operand.hbm [shape: f32[1,128], index: 2, kind: input, shape index: {}]   ;;  %s1231_s3 = inlined_call_operand.hbm [shape: f32[2,2,128], index: 3, kind: output, shape index: {}]  }
   0x1   :  { %1243 = sst [smem:[#allocation22_spill]] %s1229_s1 }
   0x2   :  { %8 = vsyncpa [#allocation3], 0 }
   0x3   :  { %10 = vsyncpa [#allocation3 + $0x1], 0 }
   0x4   :  { %11 = vsyncpa [#allocation6], 0 }
   0x5   :  { %12 = vsyncpa [#allocation4], 0 }
   0x6   :  { %14 = vsyncpa [#allocation4 + $0x1], 0  ;;  %s944_s12 = smov 0   ;;  %s946_s13 = smov 0  }
   0x7   :  { %s948_s14 = smov 0   ;;  %s950_s15 = smov 0  }
   0x8   :  { %s952_s16 = smov 0   ;;  %s954_s17 = smov 0  }
   0x9   :  { %s956_s18 = smov 0   ;;  %s958_s19 = smov 0  }
   0xa   :  { %s960_s20 = smov 0   ;;  %s962_s21 = smov 0  }
   0xb   :  { %s964_s22 = smov 0  }
   0xc LB: > { %1244 = sst [smem:[#allocation15_spill]] %s869_s12  ;;  %s517_s23 = sadd.s32 4294967295, %s909_s22   ;;  %s909_s22 = sphi %s964_s22, %s20_s22   ;;  %s905_s21 = sphi %s962_s21, %s1280_s21   ;;  %s901_s20 = sphi %s960_s20, %s1279_s20   ;;  %s897_s19 = sphi %s958_s19, %s1278_s19   ;;  %s893_s18 = sphi %s956_s18, %s1277_s18   ;;  %s889_s17 = sphi %s954_s17, %s1276_s17   ;;  %s885_s16 = sphi %s952_s16, %s1275_s16   ;;  %s881_s15 = sphi %s950_s15, %s1274_s15   ;;  %s877_s14 = sphi %s948_s14, %s1268_s14   ;;  %s873_s13 = sphi %s946_s13, %s1273_s13   ;;  %s869_s12 = sphi %s944_s12, %s1272_s12  }
   0xd   : > { %1245 = sst [smem:[#allocation16_spill]] %s877_s14  ;;  %s518_s24 = sadd.s32 4294967294, %s909_s22  }
   0xe   : > { %s29_s25 = sadd.s32 1, %s901_s20  ;;  %s32_s26 = sadd.s32 1, %s905_s21 }
   0xf   : > { %p30_p0 = scmp.ge.s32.totalorder %s29_s25, 2  ;;  %s41_s27 = sadd.s32 1, %s889_s17 }
  0x10   : > { %p48_p1 = scmp.ne.s32.totalorder %s889_s17, %s885_s16  ;;  %p49_p2 = scmp.eq.s32.totalorder %s909_s22, 0 }
  0x11   : > { %s1282_s25 = smov (%p30_p0, %s29_s25), 0  ;;  %s1284_s26 = smov (!%p30_p0, %s32_s26), %s905_s21 }
  0x12   : > { %1246 = sst [smem:[#allocation17_spill]] %s1282_s25  ;;  %s36_s28 = ssub.s32 %s901_s20, %s1282_s25 }
  0x13   : > { %p1010_p3 = por %p49_p2, %p48_p1  ;;  %p34_p4 = scmp.ge.s32.totalorder %s1284_s26, 2 }
  0x14   : > { %p54_p5 = scmp.ne.s32.totalorder %s885_s16, %s881_s15  ;;  %p1015_p6 = scmp.eq.s32.totalorder %s517_s23, 0 }
  0x15   : > { %s1247_s29 = scalar_select %p1010_p3, 1, 0 }
  0x16   : > { %s1248_s30 = scalar_select %p1015_p6, 1, 0 }
  0x17   : > { %s109_s4 = sadd.s32 1, %s877_s14  ;;  %s1286_s26 = smov (%p34_p4, %s1284_s26), 0 }
  0x18   : > { %1249 = sst [smem:[#allocation18_spill]] %s1286_s26  ;;  %p1024_p7 = por %p1015_p6, %p54_p5 }
  0x19   : > { %p119_p8 = scmp.ne.s32.totalorder %s877_s14, %s873_s13  ;;  %s37_s6 = ssub.s32 %s905_s21, %s1286_s26 }
  0x1a   : > { %s1250_s5 = scalar_select %p1024_p7, 1, 0 }
  0x1b   : > { %p120_p9 = scmp.eq.s32.totalorder %s517_s23, 3  ;;  %s38_s7 = sor.u32 %s37_s6, %s36_s28 }
  0x1c   : > { %p107_p10 = scmp.eq.s32.totalorder %s37_s6, 0  ;;  %p39_p11 = scmp.eq.s32.totalorder %s38_s7, 0 }
  0x1d   : > { %p1032_p12 = por %p120_p9, %p119_p8  ;;  %p125_p13 = scmp.ne.s32.totalorder %s873_s13, %s869_s12 }
  0x1e   : > { %s1037_s9 = scalar_select %p107_p10, %s877_s14, %s109_s4  }
  0x1f   : > { %s1251_s8 = scalar_select %p1032_p12, 1, 0 }
  0x20   : > { %1252 = sst [smem:[#allocation19_spill]] %s1037_s9  ;;  %p126_p0 = scmp.eq.s32.totalorder %s518_s24, 3 }
  0x21   : > { %s1040_s10 = scalar_select %p39_p11, %s889_s17, %s41_s27  }
  0x22   : > { %p519_p1 = scmp.ge.s32.totalorder %s909_s22, 1  ;;  %p133_p2 = scmp.lt.s32.totalorder %s909_s22, 5 }
  0x23   : > { %1253 = sst [smem:[#allocation20_spill]] %s1040_s10  ;;  %p1046_p4 = por %p126_p0, %p125_p13 }
  0x24   : > { %p1050_p5 = pnand %p519_p1, %p133_p2  ;;  %s911_s23 = smov [#allocation5]  }
  0x25   : > { %s1254_s11 = scalar_select %p1046_p4, 1, 0 }
  0x26   : > { %s1256_s15 = scalar_select %p1050_p5, 1, 0 }
  0x27   : > { %1255 = sst [smem:[#allocation21_spill]] %s1254_s11  ;;  %s145_s28 = sshll.u32 %s911_s23, 4  ;;  %s146_s28 = int_to_ptr.vmem [resolvable:$true] %s145_s28 }
  0x28   : > { %p609_p8 = pneg %p1050_p5  ;;  %s912_s24 = smov [#allocation7]  }
  0x29   : > { %s159_s4 = sshll.u32 %s912_s24, 4  ;;  %s1258_s1 = sld [smem:[#allocation22_spill]]  ;;  %s1062_s4 = int_to_ptr.vmem [resolvable:$true] %s159_s4 }
  0x2a   : > { %p1058_p9 = pnand %p609_p8, %p1015_p6 }
  0x2c   : > { %p729_p11 = pneg %p1058_p9 }
  0x2f   : > { %s727_s26 = scalar_lea.hbm %s1258_s1, 768 }
  0x30   : > { %p728_p10 = scmp.ne.s32.totalorder %s1258_s1, %s727_s26  ;;  %p734_p1 = scmp.lt.u32.totalorder %s727_s26, %s1258_s1 }
  0x32   : > { %p730_p13 = pnand %p729_p11, %p728_p10 }
  0x34   : > { %p731_p0 = pneg %p730_p13 }
  0x36   : > { %p736_p2 = pnand %p734_p1, %p731_p0 }
  0x38   : > { %739 = shalt.err (!%p736_p2)
}
  0x39   : > { %s740_s24 = scalar_lea.vmem %s146_s28, 768  ;;  %p748_p6 = scmp.lt.s32.totalorder %s146_s28, %s146_s28 }
  0x3a   : > { %p741_p8 = scmp.ne.s32.totalorder %s146_s28, %s740_s24  ;;  %p749_p7 = scmp.lt.s32.totalorder %s740_s24, %s740_s24 }
  0x3c   : > { %p743_p4 = pnand %p741_p8, %p729_p11  ;;  %p750_p5 = por %p749_p7, %p748_p6 }
  0x3e   : > { %p744_p12 = pneg %p743_p4 }
  0x40   : > { %p751_p3 = pnand %p750_p5, %p744_p12 }
  0x42   : > { %754 = shalt.err (!%p751_p3)
}
  0x43   : > { %s913_s25 = smov 128   ;;  %s914_s6 = smov 8  }
  0x44   : > { %612 = dma.hbm_to_vmem [thread:$0]  (!%p1058_p9), %s1258_s1, 768, %s146_s28, [#allocation6], %s913_s25, %s913_s25, %s914_s6  }
  0x45   : > { %s755_s23 = scalar_lea.hbm %s1230_s2, 16 }
  0x46   : > { %p756_p4 = scmp.ne.s32.totalorder %s1230_s2, %s755_s23  ;;  %p762_p7 = scmp.lt.u32.totalorder %s755_s23, %s1230_s2 }
  0x48   : > { %p758_p3 = pnand %p756_p4, %p729_p11 }
  0x4a   : > { %p759_p6 = pneg %p758_p3 }
  0x4c   : > { %p764_p12 = pnand %p762_p7, %p759_p6 }
  0x4e   : > { %767 = shalt.err (!%p764_p12)
}
  0x4f   : > { %s768_s28 = scalar_lea.vmem %s1062_s4, 16  ;;  %s775_s14 = scalar_lea.vmem %s1062_s4, 32 }
  0x50   : > { %p769_p5 = scmp.ne.s32.totalorder %s1062_s4, %s768_s28  ;;  %p776_p0 = scmp.lt.s32.totalorder %s1062_s4, %s1062_s4 }
  0x51   : > { %p777_p1 = scmp.lt.s32.totalorder %s775_s14, %s768_s28 }
  0x52   : > { %p771_p10 = pnand %p769_p5, %p729_p11 }
  0x53   : > { %p778_p2 = por %p777_p1, %p776_p0 }
  0x54   : > { %p772_p13 = pneg %p771_p10 }
  0x56   : > { %p779_p8 = pnand %p778_p2, %p772_p13 }
  0x58   : > { %782 = shalt.err (!%p779_p8)
}
  0x59   : > { %615 = dma.hbm_to_vmem [thread:$0]  (!%p1058_p9), %s1230_s2, 16, %s1062_s4, [#allocation6]  }
  0x5a   : > { %p522_p4 = scmp.ge.s32.totalorder %s909_s22, 4 }
  0x5c   : > { %166 = sbr.rel (%p522_p4) target bundleno = 116 (0x74), region = 24 }
  0x63   : > { %s170_s25 = sand.u32 1, %s889_s17   ;;  %s536_s26 = sshll.u32 %s905_s21, 2 }
  0x64   : > { %s587_s6 = smul.u32 96, %s170_s25  ;;  %s915_s9 = smov 1024  }
  0x65   : > { %s588_s27 = smul.u32 24, %s901_s20  ;;  %p1259_p11 = scmp.ne.s32.totalorder %s1247_s29, 0 }
  0x66   : > { %s174_s10 = scalar_lea.vmem [#allocation2], %s587_s6  ;;  %s916_s24 = smov 512  }
  0x67   : > { %595 = sst [smem:[#allocation10]] (%p1259_p11), %s915_s9  ;;  %s181_s4 = sadd.s32 %s588_s27, %s536_s26 }
  0x68   : > { %s196_s7 = sshll.u32 %s174_s10, 4  ;;  %596 = sst [smem:[#allocation10 + $0x1]] (%p1259_p11), %s916_s24  ;;  %s197_s7 = int_to_ptr.vmem [resolvable:$true] %s196_s7 }
  0x69   : > { %s594_s23 = scalar_select %p1259_p11, [#allocation0], [#allocation11] }
  0x6a   : > { %s917_s14 = smov 2   ;;  %s525_s12 = sshll.u32 %s181_s4, 7 }
  0x6b   : > { %s188_s28 = sld [smem:[%s594_s23]]   ;;  %s918_s11 = smov 256  }
  0x6c   : > { %597 = sst [smem:[#allocation10 + $0x2]] (%p1259_p11), %s917_s14  ;;  %s919_s26 = smov 16  }
  0x6d   : > { %598 = sst [smem:[#allocation10 + $0x3]] (%p1259_p11), %s918_s11  ;;  %s183_s9 = scalar_lea.hbm %s1228_s0, %s525_s12 }
  0x6e   : > { %599 = sst [smem:[#allocation10 + $0x4]] (%p1259_p11), %s918_s11  ;;  %s171_s23 = scalar_lea.sflag [#allocation3], %s170_s25 }
  0x6f   : > { %600 = sst [smem:[#allocation10 + $0x5]] (%p1259_p11), %s919_s26  ;;  %s920_s1 = smov [#allocation9]  }
  0x71   : > { %s526_s10 = sshll.u32 %s188_s28, 26 }
  0x72   : > { %s527_s24 = sadd.s32 134217728, %s526_s10 }
  0x73   : > { %601 = dma.general (%p1259_p11), %s183_s9, 1536, %s197_s7, %s171_s23, %s920_s1, [#allocation10], %s527_s24, 0  }
  0x74 PF: > { %p1260_p9 = scmp.ne.s32.totalorder %s1256_s15, 0 }
  0x75   : > { %s223_s4 = sand.u32 (!%p1260_p9), 1, %s885_s16   ;;  %p1261_p3 = scmp.ne.s32.totalorder (!%p1260_p9), %s1250_s5, 0 }
  0x76   : > { %221 = sbr.rel (%p1260_p9) target bundleno = 551 (0x227), region = 32  ;;  %s224_s11 = scalar_lea.sflag (!%p1260_p9), [#allocation3], %s223_s4 }
  0x77   : > { %s589_s14 = smul.u32 (!%p1260_p9), 96, %s223_s4 }
  0x79   : > { %s1138_s26 = scalar_lea.vmem (!%p1260_p9), [#allocation2], %s589_s14 }
  0x7d   : > { %856 = dma.done.wait (%p1261_p3), %s224_s11, 1536  }
  0x7e   : > { %858 = vsyncadd (%p1261_p3), %s224_s11, 4294965760  ;;  %p1262_p6 = scmp.ne.s32.totalorder %s1248_s30, 0 }
  0x80   : > { %860 = dma.done.wait (%p1262_p6), [#allocation6], 784  }
  0x81   : > { %862 = vsyncadd (%p1262_p6), [#allocation6], 4294966512  ;;  %v921_v0 = vmov 1065369472   ;;  %v262_v1 = vld [vmem:[%s1138_s26 + $0x8] sm:$0xff]  ;;  %v264_v2 = vld [vmem:[%s1138_s26 + $0x18] sm:$0xff] }
  0x82   : > { %537 = vmatprep.subr.bf16.mxu0 %v921_v0  ;;  %571 = vmatprep.subr.bf16.mxu1 %v921_v0  ;;  %v266_v3 = vld [vmem:[%s1138_s26 + $0x28] sm:$0xff]  ;;  %v274_v4 = vpack.c.bf16 %v264_v2, %v262_v1  ;;  %v268_v5 = vld [vmem:[%s1138_s26 + $0x38] sm:$0xff]  ;;  %v261_v7 = vld [vmem:[%s1138_s26] sm:$0xff]  ;;  %v922_v19 = vmov 0   ;;  %s255_s1 = sand.u32 1, %s873_s13   ;;  %s533_s30 = sshll.u32 %s897_s19, 5 }
  0x83   : > { %538 = vmatpush3.bf16.msra.mxu0 %v921_v0  ;;  %579 = vmatpush3.bf16.msra.mxu1 %v921_v0  ;;  %v276_v6 = vpack.c.bf16 %v268_v5, %v266_v3  ;;  %v263_v8 = vld [vmem:[%s1138_s26 + $0x10] sm:$0xff]  ;;  %v265_v9 = vld [vmem:[%s1138_s26 + $0x20] sm:$0xff]  ;;  %v270_v11 = vld [vmem:[%s1138_s26 + $0x48] sm:$0xff]  ;;  %s531_s29 = sshll.u32 %s255_s1, 1  ;;  %s1166_s12 = scalar_lea.hbm %s1231_s3, %s533_s30 }
  0x84   : > { %539 = vmatprep.subr.bf16.mxu0 %v921_v0  ;;  %572 = vmatprep.subr.bf16.mxu1 %v921_v0  ;;  %v267_v10 = vld [vmem:[%s1138_s26 + $0x30] sm:$0xff]  ;;  %v272_v12 = vld [vmem:[%s1138_s26 + $0x58] sm:$0xff]  ;;  %v273_v13 = vpack.c.bf16 %v263_v8, %v261_v7  ;;  %v269_v16 = vld [vmem:[%s1138_s26 + $0x40] sm:$0xff]  ;;  %s257_s5 = scalar_lea.vmem [#allocation8], %s531_s29  ;;  %s400_s6 = scalar_lea.sflag [#allocation4], %s255_s1 }
  0x85   : > { %311 = vmatprep.mubr.bf16.mxu0 %v274_v4  ;;  %319 = vmatprep.mubr.bf16.mxu1 %v276_v6  ;;  %v275_v14 = vpack.c.bf16 %v267_v10, %v265_v9  ;;  %v278_v15 = vpack.c.bf16 %v272_v12, %v270_v11  ;;  %v271_v17 = vld [vmem:[%s1138_s26 + $0x50] sm:$0xff]  ;;  %v342_v46 = vld [vmem:[#allocation5] sm:$0xff]  ;;  %v343_v47 = vld [vmem:[#allocation5 + $0x8] sm:$0xff]  ;;  %s413_s15 = sshll.u32 %s257_s5, 4  ;;  %s397_s25 = scalar_lea.vmem %s257_s5, %s893_s18 [#allocation8]  ;;  %s1168_s15 = int_to_ptr.vmem [resolvable:$true] %s413_s15 }
  0x86   : > { %v277_v18 = vpack.c.bf16 %v271_v17, %v269_v16  ;;  %726 = vset.pattern.permute.xlu1 %v922_v19  ;;  %725 = vset.pattern.permute.xlu0 %v922_v19  ;;  %v344_v48 = vld [vmem:[#allocation5 + $0x10] sm:$0xff]  ;;  %v345_v52 = vld [vmem:[#allocation5 + $0x18] sm:$0xff]  ;;  %v346_v56 = vld [vmem:[#allocation5 + $0x20] sm:$0xff]  ;;  %s783_s27 = scalar_lea.vmem %s1168_s15, 32  ;;  %p1263_p12 = scmp.ne.s32.totalorder %s1251_s8, 0 }
  0x87   : > { %540 = vmatpush3.bf16.msra.mxu0 %v921_v0  ;;  %580 = vmatpush3.bf16.msra.mxu1 %v921_v0  ;;  %v347_v60 = vld [vmem:[#allocation5 + $0x28] sm:$0xff]  ;;  %v395_v8 = vld [vmem:[#allocation7] sm:$0x1]  ;;  %p784_p7 = scmp.ne.s32.totalorder %s1168_s15, %s783_s27  ;;  %s923_s19 = smov [#allocation8]  }
  0x88   : > { %541 = vmatprep.subr.bf16.mxu0 %v921_v0  ;;  %573 = vmatprep.subr.bf16.mxu1 %v921_v0  ;;  %s787_s18 = sshll.u32 %s923_s19, 4  ;;  %s788_s18 = int_to_ptr.vmem [resolvable:$false] %s787_s18 }
  0x89   : > { %p785_p5 = pnand %p784_p7, %p1263_p12  ;;  %s789_s9 = scalar_lea.vmem %s788_s18, 64 }
  0x8a   : > { %p790_p13 = scmp.lt.s32.totalorder %s1168_s15, %s788_s18  ;;  %p791_p0 = scmp.lt.s32.totalorder %s789_s9, %s783_s27 }
  0x8b   : > { %542 = vmatpush3.bf16.msra.mxu0 %v921_v0  ;;  %581 = vmatpush3.bf16.msra.mxu1 %v921_v0  ;;  %p786_p10 = pneg %p785_p5 }
  0x8c   : > { %543 = vmatprep.subr.bf16.mxu0 %v921_v0  ;;  %574 = vmatprep.subr.bf16.mxu1 %v921_v0  ;;  %p792_p1 = por %p791_p0, %p790_p13 }
  0x8e   : > { %p793_p2 = pnand %p792_p1, %p786_p10 }
  0x8f   : > { %544 = vmatpush3.bf16.msra.mxu0 %v921_v0  ;;  %582 = vmatpush3.bf16.msra.mxu1 %v921_v0 }
  0x90   : > { %545 = vmatprep.subr.bf16.mxu0 %v921_v0  ;;  %575 = vmatprep.subr.bf16.mxu1 %v921_v0 }
  0x93   : > { %546 = vmatpush3.bf16.msra.mxu0 %v921_v0  ;;  %583 = vmatpush3.bf16.msra.mxu1 %v921_v0 }
  0x94   : > { %547 = vmatprep.subr.bf16.mxu0 %v921_v0  ;;  %576 = vmatprep.subr.bf16.mxu1 %v921_v0 }
  0x97   : > { %548 = vmatpush3.bf16.msra.mxu0 %v921_v0  ;;  %584 = vmatpush3.bf16.msra.mxu1 %v921_v0 }
  0x98   : > { %549 = vmatprep.subr.bf16.mxu0 %v921_v0  ;;  %577 = vmatprep.subr.bf16.mxu1 %v921_v0 }
  0x9b   : > { %550 = vmatpush3.bf16.msra.mxu0 %v921_v0  ;;  %585 = vmatpush3.bf16.msra.mxu1 %v921_v0 }
  0x9c   : > { %551 = vmatprep.subr.bf16.mxu0 %v921_v0  ;;  %578 = vmatprep.subr.bf16.mxu1 %v921_v0 }
  0x9f   : > { %552 = vmatpush3.bf16.msra.mxu0 %v921_v0  ;;  %586 = vmatpush3.bf16.msra.mxu1 %v921_v0 }
  0xa2   : > { %312 = vmatmul.mubr.bf16.vlgmr.msra.gmra.mrb[0].mxu0 %v273_v13  ;;  %320 = vmatmul.mubr.bf16.vlgmr.msra.gmra.mrb[0].mxu1 %v275_v14 }
  0xa3   : > { %327 = vmatprep.mubr.bf16.mxu1 %v278_v15 }
  0xaa   : > { %328 = vmatmul.mubr.bf16.gmra.mrb[4].mxu1 %v277_v18 }
 0x175   : > { %v553_v20 = vpop.f32.mrb[0].mxu0  ;;  %v559_v21 = vpop.f32.mrb[0].mxu1 }
 0x176   : > { %v554_v22 = vpop.f32.mrb[1].mxu0  ;;  %v560_v23 = vpop.f32.mrb[1].mxu1 }
 0x177   : > { %v555_v24 = vadd.f32 %v554_v22, %v553_v20  ;;  %v561_v25 = vadd.f32 %v560_v23, %v559_v21  ;;  %v556_v26 = vpop.f32.mrb[2].mxu0  ;;  %v562_v27 = vpop.f32.mrb[2].mxu1 }
 0x178   : > { %v557_v28 = vpop.f32.mrb[3].mxu0  ;;  %v563_v29 = vpop.f32.mrb[3].mxu1 }
 0x179   : > { %v336_v30 = vmul.f32 0.00390625, %v555_v24  ;;  %v338_v31 = vmul.f32 0.00390625, %v561_v25  ;;  %v558_v32 = vadd.f32 %v557_v28, %v556_v26  ;;  %v564_v33 = vadd.f32 %v563_v29, %v562_v27 }
 0x17b   : > { %360 = vperm.xlu1 %726, %v338_v31   ;;  %350 = vperm.xlu0 %725, %v336_v30   ;;  %v337_v34 = vmul.f32 0.00390625, %v558_v32  ;;  %v339_v35 = vmul.f32 0.00390625, %v564_v33 }
 0x17d   : > { %v565_v36 = vpop.f32.mrb[4].mxu1 }
 0x17e   : > { %v566_v37 = vpop.f32.mrb[5].mxu1 }
 0x17f   : > { %v567_v38 = vadd.f32 %v566_v37, %v565_v36  ;;  %v568_v39 = vpop.f32.mrb[6].mxu1  ;;  %365 = vperm.xlu1 %726, %v339_v35   ;;  %355 = vperm.xlu0 %725, %v337_v34  }
 0x180   : > { %v569_v40 = vpop.f32.mrb[7].mxu1 }
 0x181   : > { %v340_v41 = vmul.f32 0.00390625, %v567_v38  ;;  %v570_v42 = vadd.f32 %v569_v40, %v568_v39 }
 0x183   : > { %v341_v43 = vmul.f32 0.00390625, %v570_v42  ;;  %370 = vperm.xlu0 %725, %v340_v41  }
 0x185   : > { %375 = vperm.xlu1 %726, %v341_v43  }
 0x1fa   : > { %v361_v44 = vpop.permute.xlu1 %360  ;;  %v351_v45 = vpop.permute.xlu0 %350 }
 0x1fb   : > { %v378_v50 = vmul.f32 %v351_v45, %v342_v46  ;;  %v380_v54 = vmul.f32 %v361_v44, %v344_v48 }
 0x1fe   : > { %v356_v49 = vpop.permute.xlu0 %355  ;;  %v366_v53 = vpop.permute.xlu1 %365 }
 0x1ff   : > { %v379_v51 = vmul.f32 %v356_v49, %v343_v47  ;;  %v381_v58 = vmul.f32 %v366_v53, %v345_v52 }
 0x201   : > { %v384_v55 = vadd.f32 %v379_v51, %v378_v50 }
 0x202   : > { %v371_v57 = vpop.permute.xlu0 %370 }
 0x203   : > { %v385_v59 = vadd.f32 %v384_v55, %v380_v54  ;;  %v382_v63 = vmul.f32 %v371_v57, %v346_v56 }
 0x204   : > { %v376_v61 = vpop.permute.xlu1 %375 }
 0x205   : > { %v386_v62 = vadd.f32 %v385_v59, %v381_v58  ;;  %v383_v1 = vmul.f32 %v376_v61, %v347_v60 }
 0x207   : > { %v387_v0 = vadd.f32 %v386_v62, %v382_v63 }
 0x209   : > { %v388_v2 = vadd.f32 %v387_v0, %v383_v1 }
 0x20b   : > { %v389_v3 = vrot.slane %v388_v2, 4 }
 0x20d   : > { %v390_v4 = vadd.f32 %v389_v3, %v388_v2 }
 0x20f   : > { %v391_v5 = vrot.slane %v390_v4, 2 }
 0x211   : > { %v392_v6 = vadd.f32 %v391_v5, %v390_v4 }
 0x213   : > { %v393_v7 = vrot.slane %v392_v6, 1 }
 0x215   : > { %v394_v9 = vadd.f32 %v393_v7, %v392_v6 }
 0x217   : > { %v396_v10 = vadd.f32 %v395_v8, %v394_v9 }
 0x219   : > { %398 = vst [vmem:[%s397_s25] sm:$0x1] %v396_v10 }
 0x21a   : > { %796 = shalt.err (!%p793_p2)
}
 0x21b   : > { %s797_s10 = scalar_lea.hbm %s1166_s12, 32  ;;  %s801_s4 = scalar_lea.hbm %s1231_s3, 64 }
 0x21c   : > { %p798_p8 = scmp.ne.s32.totalorder %s1166_s12, %s797_s10  ;;  %p802_p9 = scmp.lt.u32.totalorder %s1166_s12, %s1231_s3 }
 0x21d   : > { %p803_p3 = scmp.lt.u32.totalorder %s801_s4, %s797_s10  ;;  %p805_p7 = scmp.lt.u32.totalorder %s797_s10, %s1166_s12 }
 0x21e   : > { %p799_p4 = pnand %p798_p8, %p1263_p12 }
 0x21f   : > { %p804_p6 = por %p803_p3, %p802_p9 }
 0x220   : > { %p800_p11 = pneg %p799_p4 }
 0x221   : > { %p806_p5 = por %p805_p7, %p804_p6 }
 0x223   : > { %p807_p10 = pnand %p806_p5, %p800_p11 }
 0x225   : > { %810 = shalt.err (!%p807_p10)
}
 0x226   : > { %607 = dma.vmem_to_hbm [thread:$0]  (%p1263_p12), %s1168_s15, 32, %s1166_s12, %s400_s6  }
 0x227 PF: > { %s1264_s26 = sld [smem:[#allocation15_spill]]  ;;  %s1265_s1 = sld [smem:[#allocation21_spill]] }
 0x228   : > { %p624_p13 = scmp.ge.s32.totalorder %s909_s22, 2 }
 0x22d   : > { %s425_s29 = sand.u32 1, %s1264_s26   ;;  %p1266_p0 = scmp.ne.s32.totalorder %s1265_s1, 0 }
 0x22e   : > { %s426_s30 = scalar_lea.sflag [#allocation4], %s425_s29 }
 0x22f   : > { %p617_p1 = pnand %p624_p13, %p1266_p0 }
 0x231   : > { %864 = dma.done.wait (!%p617_p1), %s426_s30, 32  }
 0x232   : > { %866 = vsyncadd (!%p617_p1), %s426_s30, 4294967264  ;;  %s20_s22 = sadd.s32 1, %s909_s22   ;;  %s1267_s5 = sld [smem:[#allocation16_spill]] }
 0x233   : > { %p17_p2 = scmp.ge.s32.totalorder %s20_s22, 6   ;;  %s1268_s14 = sld [smem:[#allocation19_spill]] }
 0x234   : > { %s1269_s8 = sld [smem:[#allocation20_spill]]  ;;  %s1270_s25 = sld [smem:[#allocation17_spill]] }
 0x235   : > { %s1271_s7 = sld [smem:[#allocation18_spill]]  ;;  %s1272_s12 = smov %s873_s13 }
 0x236   : > { %s1274_s15 = smov %s885_s16  ;;  %s1275_s16 = smov %s889_s17 }
 0x237   : > { %s1277_s18 = smov %s901_s20  ;;  %s1278_s19 = smov %s905_s21 }
 0x238   : > { %s1273_s13 = smov %s1267_s5  ;;  %19 = sbr.rel (!%p17_p2) target bundleno = 12 (0xc), region = 91 }
 0x23a   : > { %s1276_s17 = smov %s1269_s8  ;;  %s1279_s20 = smov %s1270_s25 }
 0x23b   : > { %s1280_s21 = smov %s1271_s7 }
 0x23f   :  { %431 = vsyncpa [#allocation3], 1 }
 0x240   :  { %433 = vsyncpa [#allocation3 + $0x1], 1 }
 0x241   :  { %434 = vsyncpa [#allocation6], 1 }
 0x242   :  { %435 = vsyncpa [#allocation4], 1 }
 0x243   :  { %437 = vsyncpa [#allocation4 + $0x1], 1 }

// kernel: lip_reading_forward.15
= control target key start
LH: loop header
LB: loop body
LE: loop exit
PB: predicated region body
PF: predicated region fallthrough
CT: control target
= control target key end

     0   :  { %8 = vsyncpa [#allocation3], 0  ;;  %s407_s0 = inlined_call_operand.hbm [shape: f32[4,128], index: 0, kind: input, shape index: {}]   ;;  %s408_s1 = inlined_call_operand.hbm [shape: bf16[128,128], index: 1, kind: input, shape index: {}]   ;;  %s409_s2 = inlined_call_operand.hbm [shape: f32[1,128], index: 2, kind: input, shape index: {}]   ;;  %s410_s3 = inlined_call_operand.hbm [shape: f32[4,128], index: 3, kind: output, shape index: {}]  }
   0x1   :  { %9 = vsyncpa [#allocation6], 0 }
   0x2   :  { %10 = vsyncpa [#allocation4], 0  ;;  %s331_s12 = smov [#allocation5]   ;;  %s237_s16 = scalar_lea.hbm %s408_s1, 1024 }
   0x3   :  { %s26_s13 = sshll.u32 %s331_s12, 4  ;;  %p238_p0 = scmp.ne.s32.totalorder %s408_s1, %s237_s16  ;;  %s27_s13 = int_to_ptr.vmem [resolvable:$true] %s26_s13 }
   0x4   :  { %p241_p1 = scmp.lt.u32.totalorder %s237_s16, %s408_s1 }
   0x6   :  { %p243_p2 = pnand %p241_p1, %p238_p0 }
   0x8   :  { %246 = shalt.err (!%p243_p2)
}
   0x9   :  { %s247_s21 = scalar_lea.vmem %s27_s13, 1024  ;;  %p252_p4 = scmp.lt.s32.totalorder %s27_s13, %s27_s13 }
   0xa   :  { %p248_p3 = scmp.ne.s32.totalorder %s27_s13, %s247_s21  ;;  %p253_p5 = scmp.lt.s32.totalorder %s247_s21, %s247_s21 }
   0xc   :  { %p254_p6 = por %p253_p5, %p252_p4 }
   0xe   :  { %p255_p7 = pnand %p254_p6, %p248_p3 }
  0x10   :  { %258 = shalt.err (!%p255_p7)
}
  0x11   :  { %s332_s22 = smov 64   ;;  %s333_s23 = smov 4  }
  0x12   :  { %32 = dma.hbm_to_vmem [thread:$0]  %s408_s1, 1024, %s27_s13, [#allocation6], %s332_s22, %s332_s22, %s333_s23  }
  0x13   :  { %s334_s26 = smov [#allocation2]   ;;  %s335_s28 = smov [#allocation7]  }
  0x14   :  { %s17_s27 = sshll.u32 %s334_s26, 4  ;;  %s39_s29 = sshll.u32 %s335_s28, 4  ;;  %s18_s27 = int_to_ptr.vmem [resolvable:$true] %s17_s27  ;;  %s40_s29 = int_to_ptr.vmem [resolvable:$true] %s39_s29 }
  0x15   :  { %s259_s5 = scalar_lea.hbm %s407_s0, 64 }
  0x16   :  { %p260_p8 = scmp.ne.s32.totalorder %s407_s0, %s259_s5  ;;  %p263_p9 = scmp.lt.u32.totalorder %s259_s5, %s407_s0 }
  0x18   :  { %p265_p10 = pnand %p263_p9, %p260_p8 }
  0x1a   :  { %268 = shalt.err (!%p265_p10)
}
  0x1b   :  { %s269_s1 = scalar_lea.vmem %s18_s27, 64  ;;  %p274_p12 = scmp.lt.s32.totalorder %s18_s27, %s18_s27 }
  0x1c   :  { %p270_p11 = scmp.ne.s32.totalorder %s18_s27, %s269_s1  ;;  %p275_p13 = scmp.lt.s32.totalorder %s269_s1, %s269_s1 }
  0x1e   :  { %p276_p0 = por %p275_p13, %p274_p12 }
  0x20   :  { %p277_p1 = pnand %p276_p0, %p270_p11 }
  0x22   :  { %280 = shalt.err (!%p277_p1)
}
  0x23   :  { %20 = dma.hbm_to_vmem [thread:$0]  %s407_s0, 64, %s18_s27, [#allocation3]  }
  0x24   :  { %s281_s14 = scalar_lea.hbm %s409_s2, 16 }
  0x25   :  { %p282_p2 = scmp.ne.s32.totalorder %s409_s2, %s281_s14  ;;  %p285_p3 = scmp.lt.u32.totalorder %s281_s14, %s409_s2 }
  0x27   :  { %p287_p4 = pnand %p285_p3, %p282_p2 }
  0x29   :  { %290 = shalt.err (!%p287_p4)
}
  0x2a   :  { %s291_s19 = scalar_lea.vmem %s40_s29, 16  ;;  %s295_s20 = scalar_lea.vmem %s40_s29, 32 }
  0x2b   :  { %p292_p5 = scmp.ne.s32.totalorder %s40_s29, %s291_s19  ;;  %p296_p6 = scmp.lt.s32.totalorder %s40_s29, %s40_s29 }
  0x2c   :  { %p297_p7 = scmp.lt.s32.totalorder %s295_s20, %s291_s19 }
  0x2e   :  { %p298_p8 = por %p297_p7, %p296_p6 }
  0x30   :  { %p299_p9 = pnand %p298_p8, %p292_p5 }
  0x32   :  { %302 = shalt.err (!%p299_p9)
}
  0x33   :  { %42 = dma.hbm_to_vmem [thread:$0]  %s409_s2, 16, %s40_s29, [#allocation6]  }
  0x34   :  { %325 = dma.done.wait [#allocation3], 64  }
  0x35   :  { %326 = vsyncadd [#allocation3], 4294967232 }
  0x36   :  { %327 = dma.done.wait [#allocation6], 1040  }
  0x37   :  { %328 = vsyncadd [#allocation6], 4294966256  ;;  %v336_v0 = vmov 0.0   ;;  %vm337_vm0 = vmmov 0   ;;  %v229_v1 = vld [vmem:[#allocation5] sm:$0xff]   ;;  %v230_v2 = vld [vmem:[#allocation5 + $0x8] sm:$0xff]  }
  0x38   :  { %201 = vmatprep.subr.bf16.mxu0 %v336_v0  ;;  %217 = vmatprep.mubr.msk.bf16.mxu0 %vm337_vm0, %v336_v0  ;;  %v231_v3 = vld [vmem:[#allocation5 + $0x10] sm:$0xff]   ;;  %v232_v4 = vld [vmem:[#allocation5 + $0x18] sm:$0xff]   ;;  %v233_v5 = vld [vmem:[#allocation5 + $0x20] sm:$0xff]   ;;  %s338_s2 = smov [#allocation8]  }
  0x39   :  { %202 = vmatpush3.bf16.msra.mxu0 %v229_v1  ;;  %v234_v6 = vld [vmem:[#allocation5 + $0x28] sm:$0xff]   ;;  %v235_v7 = vld [vmem:[#allocation5 + $0x30] sm:$0xff]   ;;  %v236_v8 = vld [vmem:[#allocation5 + $0x38] sm:$0xff]   ;;  %s173_s22 = sshll.u32 %s338_s2, 4  ;;  %s174_s22 = int_to_ptr.vmem [resolvable:$true] %s173_s22 }
  0x3a   :  { %203 = vmatprep.subr.bf16.mxu0 %v336_v0  ;;  %v53_v9 = vld [vmem:[#allocation2] sm:$0xf]  ;;  %v183_v11 = vld [vmem:[#allocation7] ss:$0 sm:$0xff]  ;;  %s303_s23 = scalar_lea.vmem %s174_s22, 64  ;;  %p308_p11 = scmp.lt.s32.totalorder %s174_s22, %s174_s22 }
  0x3b   :  { %v54_v10 = vpack.c.bf16 %v53_v9, %v53_v9  ;;  %p304_p10 = scmp.ne.s32.totalorder %s174_s22, %s303_s23  ;;  %p309_p12 = scmp.lt.s32.totalorder %s303_s23, %s303_s23 }
  0x3d   :  { %204 = vmatpush3.bf16.msra.mxu0 %v230_v2  ;;  %p310_p13 = por %p309_p12, %p308_p11 }
  0x3e   :  { %205 = vmatprep.subr.bf16.mxu0 %v336_v0 }
  0x3f   :  { %p311_p0 = pnand %p310_p13, %p304_p10 }
  0x41   :  { %206 = vmatpush3.bf16.msra.mxu0 %v231_v3 }
  0x42   :  { %207 = vmatprep.subr.bf16.mxu0 %v336_v0 }
  0x45   :  { %208 = vmatpush3.bf16.msra.mxu0 %v232_v4 }
  0x46   :  { %209 = vmatprep.subr.bf16.mxu0 %v336_v0 }
  0x49   :  { %210 = vmatpush3.bf16.msra.mxu0 %v233_v5 }
  0x4a   :  { %211 = vmatprep.subr.bf16.mxu0 %v336_v0 }
  0x4d   :  { %212 = vmatpush3.bf16.msra.mxu0 %v234_v6 }
  0x4e   :  { %213 = vmatprep.subr.bf16.mxu0 %v336_v0 }
  0x51   :  { %214 = vmatpush3.bf16.msra.mxu0 %v235_v7 }
  0x52   :  { %215 = vmatprep.subr.bf16.mxu0 %v336_v0 }
  0x55   :  { %216 = vmatpush3.bf16.msra.mxu0 %v236_v8 }
  0x58   :  { %218 = vmatmul.mubr.bf16.vlgmr.msra.gmra.mrb[0].mxu0 %v54_v10 }
 0x12b   :  { %v160_v12 = vpop.f32.mrb[0].mxu0 }
 0x12c   :  { %v161_v13 = vadd.f32 %v183_v11, %v160_v12  ;;  %v219_v14 = vpop.f32.mrb[1].mxu0 }
 0x12d   :  { %v163_v15 = vpop.f32.mrb[2].mxu0 }
 0x12e   :  { %166 = vst [vmem:[#allocation8] sm:$0xf] %v161_v13  ;;  %v220_v16 = vpop.f32.mrb[3].mxu0 }
 0x12f   :  { %314 = shalt.err (!%p311_p0)
}
 0x130   :  { %s315_s26 = scalar_lea.hbm %s410_s3, 64 }
 0x131   :  { %p316_p1 = scmp.ne.s32.totalorder %s410_s3, %s315_s26  ;;  %p319_p2 = scmp.lt.u32.totalorder %s315_s26, %s410_s3 }
 0x133   :  { %p321_p3 = pnand %p319_p2, %p316_p1 }
 0x135   :  { %324 = shalt.err (!%p321_p3)
}
 0x136   :  { %176 = dma.vmem_to_hbm [thread:$0]  %s174_s22, 64, %s410_s3, [#allocation4]  }
 0x137   :  { %329 = dma.done.wait [#allocation4], 64  }
 0x138   :  { %330 = vsyncadd [#allocation4], 4294967232 }
 0x139   :  { %180 = vsyncpa [#allocation3], 1 }
 0x13a   :  { %181 = vsyncpa [#allocation6], 1 }
 0x13b   :  { %182 = vsyncpa [#allocation4], 1 }

// kernel: lip_reading_forward.9
= control target key start
LH: loop header
LB: loop body
LE: loop exit
PB: predicated region body
PF: predicated region fallthrough
CT: control target
= control target key end

     0   :  { %18 = vsyncpa [#allocation3], 0  ;;  %s3304_s0 = inlined_call_operand.hbm [shape: f32[4,128], index: 0, kind: input, shape index: {}]   ;;  %s3305_s1 = inlined_call_operand.hbm [shape: bf16[128,384], index: 1, kind: input, shape index: {}]   ;;  %s3306_s2 = inlined_call_operand.hbm [shape: f32[1,384], index: 2, kind: input, shape index: {}]   ;;  %s3307_s3 = inlined_call_operand.hbm [shape: bf16[128,128], index: 3, kind: input, shape index: {}]   ;;  %s3308_s4 = inlined_call_operand.hbm [shape: f32[1,128], index: 4, kind: input, shape index: {}]   ;;  %s3309_s5 = inlined_call_operand.hbm [shape: f32[1,128], index: 5, kind: input, shape index: {}]   ;;  %s3310_s6 = inlined_call_operand.hbm [shape: f32[1,128], index: 6, kind: input, shape index: {}]   ;;  %s3311_s7 = inlined_call_operand.hbm [shape: bf16[128,256], index: 7, kind: input, shape index: {}]   ;;  %s3312_s8 = inlined_call_operand.hbm [shape: f32[1,256], index: 8, kind: input, shape index: {}]   ;;  %s3313_s9 = inlined_call_operand.hbm [shape: bf16[256,128], index: 9, kind: input, shape index: {}]   ;;  %s3314_s10 = inlined_call_operand.hbm [shape: f32[1,128], index: 10, kind: input, shape index: {}]   ;;  %s3315_s11 = inlined_call_operand.hbm [shape: f32[1,128], index: 11, kind: input, shape index: {}]   ;;  %s3316_s12 = inlined_call_operand.hbm [shape: f32[1,128], index: 12, kind: input, shape index: {}]   ;;  %s3317_s13 = inlined_call_operand.hbm [shape: f32[4,128], index: 13, kind: output, shape index: {}]  }
   0x1   :  { %19 = vsyncpa [#allocation6], 0 }
   0x2   :  { %20 = vsyncpa [#allocation9], 0 }
   0x3   :  { %21 = vsyncpa [#allocation12], 0 }
   0x4   :  { %22 = vsyncpa [#allocation15], 0 }
   0x5   :  { %23 = vsyncpa [#allocation18], 0 }
   0x6   :  { %24 = vsyncpa [#allocation21], 0 }
   0x7   :  { %25 = vsyncpa [#allocation4], 0  ;;  %s2817_s25 = smov [#allocation5]   ;;  %s2493_s29 = scalar_lea.hbm %s3305_s1, 3072 }
   0x8   :  { %s41_s26 = sshll.u32 %s2817_s25, 4  ;;  %p2494_p0 = scmp.ne.s32.totalorder %s3305_s1, %s2493_s29  ;;  %s42_s26 = int_to_ptr.vmem [resolvable:$true] %s41_s26 }
   0x9   :  { %p2497_p1 = scmp.lt.u32.totalorder %s2493_s29, %s3305_s1 }
   0xb   :  { %p2499_p2 = pnand %p2497_p1, %p2494_p0 }
   0xd   :  { %2502 = shalt.err (!%p2499_p2)
}
   0xe   :  { %s2503_s17 = scalar_lea.vmem %s42_s26, 3072  ;;  %p2508_p4 = scmp.lt.s32.totalorder %s42_s26, %s42_s26 }
   0xf   :  { %p2504_p3 = scmp.ne.s32.totalorder %s42_s26, %s2503_s17  ;;  %p2509_p5 = scmp.lt.s32.totalorder %s2503_s17, %s2503_s17 }
  0x11   :  { %p2510_p6 = por %p2509_p5, %p2508_p4 }
  0x13   :  { %p2511_p7 = pnand %p2510_p6, %p2504_p3 }
  0x15   :  { %2514 = shalt.err (!%p2511_p7)
}
  0x16   :  { %s2818_s18 = smov 192   ;;  %s2819_s19 = smov 12  }
  0x17   :  { %47 = dma.hbm_to_vmem [thread:$0]  %s3305_s1, 3072, %s42_s26, [#allocation6], %s2818_s18, %s2818_s18, %s2819_s19  }
  0x18   :  { %s2820_s22 = smov [#allocation8]   ;;  %s2515_s27 = scalar_lea.hbm %s3307_s3, 1024 }
  0x19   :  { %s63_s23 = sshll.u32 %s2820_s22, 4  ;;  %p2516_p8 = scmp.ne.s32.totalorder %s3307_s3, %s2515_s27  ;;  %s64_s23 = int_to_ptr.vmem [resolvable:$true] %s63_s23 }
  0x1a   :  { %p2519_p9 = scmp.lt.u32.totalorder %s2515_s27, %s3307_s3 }
  0x1c   :  { %p2521_p10 = pnand %p2519_p9, %p2516_p8 }
  0x1e   :  { %2524 = shalt.err (!%p2521_p10)
}
  0x1f   :  { %s2525_s15 = scalar_lea.vmem %s64_s23, 1024  ;;  %p2530_p12 = scmp.lt.s32.totalorder %s64_s23, %s64_s23 }
  0x20   :  { %p2526_p11 = scmp.ne.s32.totalorder %s64_s23, %s2525_s15  ;;  %p2531_p13 = scmp.lt.s32.totalorder %s2525_s15, %s2525_s15 }
  0x22   :  { %p2532_p0 = por %p2531_p13, %p2530_p12 }
  0x24   :  { %p2533_p1 = pnand %p2532_p0, %p2526_p11 }
  0x26   :  { %2536 = shalt.err (!%p2533_p1)
}
  0x27   :  { %s2821_s1 = smov 64   ;;  %s2822_s26 = smov 4  }
  0x28   :  { %69 = dma.hbm_to_vmem [thread:$0]  %s3307_s3, 1024, %s64_s23, [#allocation9], %s2821_s1, %s2821_s1, %s2822_s26  }
  0x29   :  { %s2823_s18 = smov [#allocation11]   ;;  %s2824_s20 = smov [#allocation14]  }
  0x2a   :  { %s86_s19 = sshll.u32 %s2823_s18, 4  ;;  %s105_s21 = sshll.u32 %s2824_s20, 4  ;;  %s87_s19 = int_to_ptr.vmem [resolvable:$true] %s86_s19  ;;  %s2939_s21 = int_to_ptr.vmem [resolvable:$true] %s105_s21 }
  0x2b   :  { %s2537_s25 = scalar_lea.hbm %s3309_s5, 16 }
  0x2c   :  { %p2538_p2 = scmp.ne.s32.totalorder %s3309_s5, %s2537_s25  ;;  %p2541_p3 = scmp.lt.u32.totalorder %s2537_s25, %s3309_s5 }
  0x2e   :  { %p2543_p4 = pnand %p2541_p3, %p2538_p2 }
  0x30   :  { %2546 = shalt.err (!%p2543_p4)
}
  0x31   :  { %s2547_s3 = scalar_lea.vmem %s87_s19, 16  ;;  %s2551_s23 = scalar_lea.vmem %s87_s19, 32 }
  0x32   :  { %p2548_p5 = scmp.ne.s32.totalorder %s87_s19, %s2547_s3  ;;  %p2552_p6 = scmp.lt.s32.totalorder %s87_s19, %s87_s19 }
  0x33   :  { %p2553_p7 = scmp.lt.s32.totalorder %s2551_s23, %s2547_s3 }
  0x35   :  { %p2554_p8 = por %p2553_p7, %p2552_p6 }
  0x37   :  { %p2555_p9 = pnand %p2554_p8, %p2548_p5 }
  0x39   :  { %2558 = shalt.err (!%p2555_p9)
}
  0x3a   :  { %89 = dma.hbm_to_vmem [thread:$0]  %s3309_s5, 16, %s87_s19, [#allocation12]  }
  0x3b   :  { %s2559_s18 = scalar_lea.hbm %s3311_s7, 2048 }
  0x3c   :  { %p2560_p10 = scmp.ne.s32.totalorder %s3311_s7, %s2559_s18  ;;  %p2563_p11 = scmp.lt.u32.totalorder %s2559_s18, %s3311_s7 }
  0x3e   :  { %p2565_p12 = pnand %p2563_p11, %p2560_p10 }
  0x40   :  { %2568 = shalt.err (!%p2565_p12)
}
  0x41   :  { %s2569_s27 = scalar_lea.vmem %s2939_s21, 2048  ;;  %p2574_p0 = scmp.lt.s32.totalorder %s2939_s21, %s2939_s21 }
  0x42   :  { %p2570_p13 = scmp.ne.s32.totalorder %s2939_s21, %s2569_s27  ;;  %p2575_p1 = scmp.lt.s32.totalorder %s2569_s27, %s2569_s27 }
  0x44   :  { %p2576_p2 = por %p2575_p1, %p2574_p0 }
  0x46   :  { %p2577_p3 = pnand %p2576_p2, %p2570_p13 }
  0x48   :  { %2580 = shalt.err (!%p2577_p3)
}
  0x49   :  { %s2825_s5 = smov 128   ;;  %s2826_s19 = smov 8  }
  0x4a   :  { %111 = dma.hbm_to_vmem [thread:$0]  %s3311_s7, 2048, %s2939_s21, [#allocation15], %s2825_s5, %s2825_s5, %s2826_s19  }
  0x4b   :  { %s2827_s30 = smov [#allocation17]   ;;  %s2828_s23 = smov [#allocation20]  }
  0x4c   :  { %s127_s3 = sshll.u32 %s2827_s30, 4  ;;  %s150_s14 = sshll.u32 %s2828_s23, 4  ;;  %s128_s3 = int_to_ptr.vmem [resolvable:$true] %s127_s3  ;;  %s151_s14 = int_to_ptr.vmem [resolvable:$true] %s150_s14 }
  0x4d   :  { %s2581_s17 = scalar_lea.hbm %s3313_s9, 2048 }
  0x4e   :  { %p2582_p4 = scmp.ne.s32.totalorder %s3313_s9, %s2581_s17  ;;  %p2585_p5 = scmp.lt.u32.totalorder %s2581_s17, %s3313_s9 }
  0x50   :  { %p2587_p6 = pnand %p2585_p5, %p2582_p4 }
  0x52   :  { %2590 = shalt.err (!%p2587_p6)
}
  0x53   :  { %s2591_s7 = scalar_lea.vmem %s128_s3, 2048  ;;  %p2596_p8 = scmp.lt.s32.totalorder %s128_s3, %s128_s3 }
  0x54   :  { %p2592_p7 = scmp.ne.s32.totalorder %s128_s3, %s2591_s7  ;;  %p2597_p9 = scmp.lt.s32.totalorder %s2591_s7, %s2591_s7 }
  0x56   :  { %p2598_p10 = por %p2597_p9, %p2596_p8 }
  0x58   :  { %p2599_p11 = pnand %p2598_p10, %p2592_p7 }
  0x5a   :  { %2602 = shalt.err (!%p2599_p11)
}
  0x5b   :  { %133 = dma.hbm_to_vmem [thread:$0]  %s3313_s9, 2048, %s128_s3, [#allocation18], %s2821_s1, %s2821_s1, %s2822_s26  }
  0x5c   :  { %s2603_s19 = scalar_lea.hbm %s3315_s11, 16 }
  0x5d   :  { %p2604_p12 = scmp.ne.s32.totalorder %s3315_s11, %s2603_s19  ;;  %p2607_p13 = scmp.lt.u32.totalorder %s2603_s19, %s3315_s11 }
  0x5f   :  { %p2609_p0 = pnand %p2607_p13, %p2604_p12 }
  0x61   :  { %2612 = shalt.err (!%p2609_p0)
}
  0x62   :  { %s2613_s15 = scalar_lea.vmem %s151_s14, 16  ;;  %s2617_s16 = scalar_lea.vmem %s151_s14, 32 }
  0x63   :  { %p2614_p1 = scmp.ne.s32.totalorder %s151_s14, %s2613_s15  ;;  %p2618_p2 = scmp.lt.s32.totalorder %s151_s14, %s151_s14 }
  0x64   :  { %p2619_p3 = scmp.lt.s32.totalorder %s2617_s16, %s2613_s15 }
  0x66   :  { %p2620_p4 = por %p2619_p3, %p2618_p2 }
  0x68   :  { %p2621_p5 = pnand %p2620_p4, %p2614_p1 }
  0x6a   :  { %2624 = shalt.err (!%p2621_p5)
}
  0x6b   :  { %153 = dma.hbm_to_vmem [thread:$0]  %s3315_s11, 16, %s151_s14, [#allocation21]  }
  0x6c   :  { %s2829_s3 = smov [#allocation2]   ;;  %s2830_s18 = smov [#allocation7]  }
  0x6d   :  { %s32_s17 = sshll.u32 %s2829_s3, 4  ;;  %s54_s20 = sshll.u32 %s2830_s18, 4  ;;  %s33_s17 = int_to_ptr.vmem [resolvable:$true] %s32_s17  ;;  %s55_s20 = int_to_ptr.vmem [resolvable:$true] %s54_s20 }
  0x6e   :  { %s2625_s7 = scalar_lea.hbm %s3304_s0, 64 }
  0x6f   :  { %p2626_p6 = scmp.ne.s32.totalorder %s3304_s0, %s2625_s7  ;;  %p2629_p7 = scmp.lt.u32.totalorder %s2625_s7, %s3304_s0 }
  0x71   :  { %p2631_p8 = pnand %p2629_p7, %p2626_p6 }
  0x73   :  { %2634 = shalt.err (!%p2631_p8)
}
  0x74   :  { %s2635_s11 = scalar_lea.vmem %s33_s17, 64  ;;  %p2640_p10 = scmp.lt.s32.totalorder %s33_s17, %s33_s17 }
  0x75   :  { %p2636_p9 = scmp.ne.s32.totalorder %s33_s17, %s2635_s11  ;;  %p2641_p11 = scmp.lt.s32.totalorder %s2635_s11, %s2635_s11 }
  0x77   :  { %p2642_p12 = por %p2641_p11, %p2640_p10 }
  0x79   :  { %p2643_p13 = pnand %p2642_p12, %p2636_p9 }
  0x7b   :  { %2646 = shalt.err (!%p2643_p13)
}
  0x7c   :  { %35 = dma.hbm_to_vmem [thread:$0]  %s3304_s0, 64, %s33_s17, [#allocation3]  }
  0x7d   :  { %s2647_s30 = scalar_lea.hbm %s3306_s2, 48 }
  0x7e   :  { %p2648_p0 = scmp.ne.s32.totalorder %s3306_s2, %s2647_s30  ;;  %p2651_p1 = scmp.lt.u32.totalorder %s2647_s30, %s3306_s2 }
  0x80   :  { %p2653_p2 = pnand %p2651_p1, %p2648_p0 }
  0x82   :  { %2656 = shalt.err (!%p2653_p2)
}
  0x83   :  { %s2657_s26 = scalar_lea.vmem %s55_s20, 48  ;;  %s2661_s3 = scalar_lea.vmem %s55_s20, 64 }
  0x84   :  { %p2658_p3 = scmp.ne.s32.totalorder %s55_s20, %s2657_s26  ;;  %p2662_p4 = scmp.lt.s32.totalorder %s55_s20, %s55_s20 }
  0x85   :  { %p2663_p5 = scmp.lt.s32.totalorder %s2661_s3, %s2657_s26 }
  0x87   :  { %p2664_p6 = por %p2663_p5, %p2662_p4 }
  0x89   :  { %p2665_p7 = pnand %p2664_p6, %p2658_p3 }
  0x8b   :  { %2668 = shalt.err (!%p2665_p7)
}
  0x8c   :  { %57 = dma.hbm_to_vmem [thread:$0]  %s3306_s2, 48, %s55_s20, [#allocation6]  }
  0x8d   :  { %s2831_s18 = smov [#allocation10]   ;;  %s2832_s24 = smov [#allocation13]  }
  0x8e   :  { %s76_s22 = sshll.u32 %s2831_s18, 4  ;;  %s96_s7 = sshll.u32 %s2832_s24, 4  ;;  %s77_s22 = int_to_ptr.vmem [resolvable:$true] %s76_s22  ;;  %s97_s7 = int_to_ptr.vmem [resolvable:$true] %s96_s7 }
  0x8f   :  { %s2669_s27 = scalar_lea.hbm %s3308_s4, 16 }
  0x90   :  { %p2670_p8 = scmp.ne.s32.totalorder %s3308_s4, %s2669_s27  ;;  %p2673_p9 = scmp.lt.u32.totalorder %s2669_s27, %s3308_s4 }
  0x92   :  { %p2675_p10 = pnand %p2673_p9, %p2670_p8 }
  0x94   :  { %2678 = shalt.err (!%p2675_p10)
}
  0x95   :  { %s2679_s2 = scalar_lea.vmem %s77_s22, 16  ;;  %s2683_s20 = scalar_lea.vmem %s77_s22, 32 }
  0x96   :  { %p2680_p11 = scmp.ne.s32.totalorder %s77_s22, %s2679_s2  ;;  %p2684_p12 = scmp.lt.s32.totalorder %s77_s22, %s77_s22 }
  0x97   :  { %p2685_p13 = scmp.lt.s32.totalorder %s2683_s20, %s2679_s2 }
  0x99   :  { %p2686_p0 = por %p2685_p13, %p2684_p12 }
  0x9b   :  { %p2687_p1 = pnand %p2686_p0, %p2680_p11 }
  0x9d   :  { %2690 = shalt.err (!%p2687_p1)
}
  0x9e   :  { %79 = dma.hbm_to_vmem [thread:$0]  %s3308_s4, 16, %s77_s22, [#allocation9]  }
  0x9f   :  { %s2691_s15 = scalar_lea.hbm %s3310_s6, 16 }
  0xa0   :  { %p2692_p2 = scmp.ne.s32.totalorder %s3310_s6, %s2691_s15  ;;  %p2695_p3 = scmp.lt.u32.totalorder %s2691_s15, %s3310_s6 }
  0xa2   :  { %p2697_p4 = pnand %p2695_p3, %p2692_p2 }
  0xa4   :  { %2700 = shalt.err (!%p2697_p4)
}
  0xa5   :  { %s2701_s0 = scalar_lea.vmem %s97_s7, 16  ;;  %s2705_s17 = scalar_lea.vmem %s97_s7, 32 }
  0xa6   :  { %p2702_p5 = scmp.ne.s32.totalorder %s97_s7, %s2701_s0  ;;  %p2706_p6 = scmp.lt.s32.totalorder %s97_s7, %s97_s7 }
  0xa7   :  { %p2707_p7 = scmp.lt.s32.totalorder %s2705_s17, %s2701_s0 }
  0xa9   :  { %p2708_p8 = por %p2707_p7, %p2706_p6 }
  0xab   :  { %p2709_p9 = pnand %p2708_p8, %p2702_p5 }
  0xad   :  { %2712 = shalt.err (!%p2709_p9)
}
  0xae   :  { %99 = dma.hbm_to_vmem [thread:$0]  %s3310_s6, 16, %s97_s7, [#allocation12]  }
  0xaf   :  { %s2833_s22 = smov [#allocation16]   ;;  %s2834_s21 = smov [#allocation19]  }
  0xb0   :  { %s118_s24 = sshll.u32 %s2833_s22, 4  ;;  %s140_s25 = sshll.u32 %s2834_s21, 4  ;;  %s119_s24 = int_to_ptr.vmem [resolvable:$true] %s118_s24  ;;  %s141_s25 = int_to_ptr.vmem [resolvable:$true] %s140_s25 }
  0xb1   :  { %s2713_s11 = scalar_lea.hbm %s3312_s8, 32 }
  0xb2   :  { %p2714_p10 = scmp.ne.s32.totalorder %s3312_s8, %s2713_s11  ;;  %p2717_p11 = scmp.lt.u32.totalorder %s2713_s11, %s3312_s8 }
  0xb4   :  { %p2719_p12 = pnand %p2717_p11, %p2714_p10 }
  0xb6   :  { %2722 = shalt.err (!%p2719_p12)
}
  0xb7   :  { %s2723_s6 = scalar_lea.vmem %s119_s24, 32  ;;  %p2728_p0 = scmp.lt.s32.totalorder %s119_s24, %s119_s24 }
  0xb8   :  { %p2724_p13 = scmp.ne.s32.totalorder %s119_s24, %s2723_s6  ;;  %p2729_p1 = scmp.lt.s32.totalorder %s2723_s6, %s2723_s6 }
  0xba   :  { %p2730_p2 = por %p2729_p1, %p2728_p0 }
  0xbc   :  { %p2731_p3 = pnand %p2730_p2, %p2724_p13 }
  0xbe   :  { %2734 = shalt.err (!%p2731_p3)
}
  0xbf   :  { %121 = dma.hbm_to_vmem [thread:$0]  %s3312_s8, 32, %s119_s24, [#allocation15]  }
  0xc0   :  { %s2735_s23 = scalar_lea.hbm %s3314_s10, 16 }
  0xc1   :  { %p2736_p4 = scmp.ne.s32.totalorder %s3314_s10, %s2735_s23  ;;  %p2739_p5 = scmp.lt.u32.totalorder %s2735_s23, %s3314_s10 }
  0xc3   :  { %p2741_p6 = pnand %p2739_p5, %p2736_p4 }
  0xc5   :  { %2744 = shalt.err (!%p2741_p6)
}
  0xc6   :  { %s2745_s3 = scalar_lea.vmem %s141_s25, 16  ;;  %s2749_s0 = scalar_lea.vmem %s141_s25, 32 }
  0xc7   :  { %p2746_p7 = scmp.ne.s32.totalorder %s141_s25, %s2745_s3  ;;  %p2750_p8 = scmp.lt.s32.totalorder %s141_s25, %s141_s25 }
  0xc8   :  { %p2751_p9 = scmp.lt.s32.totalorder %s2749_s0, %s2745_s3 }
  0xca   :  { %p2752_p10 = por %p2751_p9, %p2750_p8 }
  0xcc   :  { %p2753_p11 = pnand %p2752_p10, %p2746_p7 }
  0xce   :  { %2756 = shalt.err (!%p2753_p11)
}
  0xcf   :  { %143 = dma.hbm_to_vmem [thread:$0]  %s3314_s10, 16, %s141_s25, [#allocation18]  }
  0xd0   :  { %s2835_s4 = smov [#allocation22]   ;;  %s2757_s21 = scalar_lea.hbm %s3316_s12, 16 }
  0xd1   :  { %s160_s18 = sshll.u32 %s2835_s4, 4  ;;  %p2758_p12 = scmp.ne.s32.totalorder %s3316_s12, %s2757_s21  ;;  %s161_s18 = int_to_ptr.vmem [resolvable:$true] %s160_s18 }
  0xd2   :  { %p2761_p13 = scmp.lt.u32.totalorder %s2757_s21, %s3316_s12 }
  0xd4   :  { %p2763_p0 = pnand %p2761_p13, %p2758_p12 }
  0xd6   :  { %2766 = shalt.err (!%p2763_p0)
}
  0xd7   :  { %s2767_s19 = scalar_lea.vmem %s161_s18, 16  ;;  %s2771_s10 = scalar_lea.vmem %s161_s18, 32 }
  0xd8   :  { %p2768_p1 = scmp.ne.s32.totalorder %s161_s18, %s2767_s19  ;;  %p2772_p2 = scmp.lt.s32.totalorder %s161_s18, %s161_s18 }
  0xd9   :  { %p2773_p3 = scmp.lt.s32.totalorder %s2771_s10, %s2767_s19 }
  0xdb   :  { %p2774_p4 = por %p2773_p3, %p2772_p2 }
  0xdd   :  { %p2775_p5 = pnand %p2774_p4, %p2768_p1 }
  0xdf   :  { %2778 = shalt.err (!%p2775_p5)
}
  0xe0   :  { %163 = dma.hbm_to_vmem [thread:$0]  %s3316_s12, 16, %s161_s18, [#allocation21]  }
  0xe1   :  { %2801 = dma.done.wait [#allocation3], 64  }
  0xe2   :  { %2802 = vsyncadd [#allocation3], 4294967232 }
  0xe3   :  { %2803 = dma.done.wait [#allocation6], 3120  }
  0xe4   :  { %2804 = vsyncadd [#allocation6], 4294964176 }
  0xe5   :  { %2805 = dma.done.wait [#allocation9], 1040  }
  0xe6   :  { %2806 = vsyncadd [#allocation9], 4294966256 }
  0xe7   :  { %2807 = dma.done.wait [#allocation12], 32  }
  0xe8   :  { %2808 = vsyncadd [#allocation12], 4294967264 }
  0xe9   :  { %2809 = dma.done.wait [#allocation15], 2080  }
  0xea   :  { %2810 = vsyncadd [#allocation15], 4294965216 }
  0xeb   :  { %2811 = dma.done.wait [#allocation18], 2064  }
  0xec   :  { %2812 = vsyncadd [#allocation18], 4294965232 }
  0xed   :  { %2813 = dma.done.wait [#allocation21], 32  }
  0xee   :  { %2814 = vsyncadd [#allocation21], 4294967264  ;;  %v2836_v0 = vmov 0   ;;  %v2837_v1 = vmov 0.0   ;;  %v2377_v2 = vld [vmem:[#allocation5 + $0x4] ss:$12 sps:$4 sm:$0xff]   ;;  %v240_v28 = vlaneseq }
  0xef   :  { %415 = vmatprep.mubr.bf16.mxu0 %v2836_v0  ;;  %2191 = vmatprep.subr.bf16.mxu1 %v2837_v1  ;;  %v2379_v3 = vld [vmem:[#allocation5] ss:$12 sps:$4 sm:$0xff]   ;;  %v2380_v4 = vld [vmem:[#allocation5 + $0x1c] ss:$12 sps:$4 sm:$0xff]   ;;  %v2382_v5 = vld [vmem:[#allocation5 + $0x18] ss:$12 sps:$4 sm:$0xff]  }
  0xf0   :  { %383 = vmatprep.subr.bf16.mxu0 %v2377_v2  ;;  %v2383_v6 = vld [vmem:[#allocation5 + $0x34] ss:$12 sps:$4 sm:$0xff]   ;;  %v2385_v7 = vld [vmem:[#allocation5 + $0x30] ss:$12 sps:$4 sm:$0xff]   ;;  %v2386_v8 = vld [vmem:[#allocation5 + $0x4c] ss:$12 sps:$4 sm:$0xff]  }
  0xf1   :  { %384 = vmatpush1.bf16.msra.mxu0 %v2379_v3  ;;  %v2388_v9 = vld [vmem:[#allocation5 + $0x48] ss:$12 sps:$4 sm:$0xff]   ;;  %v2389_v11 = vld [vmem:[#allocation5 + $0x64] ss:$12 sps:$4 sm:$0xff]   ;;  %v2402_v12 = vld [vmem:[#allocation5 + $0x20] ss:$12 sps:$4 sm:$0xff]  }
  0xf2   :  { %385 = vmatprep.subr.bf16.mxu0 %v2380_v4  ;;  %v2401_v10 = vld [vmem:[#allocation5 + $0x8] ss:$12 sps:$4 sm:$0xff]   ;;  %v2391_v13 = vld [vmem:[#allocation5 + $0x60] ss:$12 sps:$4 sm:$0xff]   ;;  %v2394_v15 = vld [vmem:[#allocation5 + $0x78] ss:$12 sps:$4 sm:$0xff]  }
  0xf3   :  { %2192 = vmatpush3.bf16.msra.mxu1 %v2401_v10  ;;  %v2392_v14 = vld [vmem:[#allocation5 + $0x7c] ss:$12 sps:$4 sm:$0xff]   ;;  %v2403_v16 = vld [vmem:[#allocation5 + $0x38] ss:$12 sps:$4 sm:$0xff]   ;;  %v2395_v17 = vld [vmem:[#allocation5 + $0x94] ss:$12 sps:$4 sm:$0xff]  }
  0xf4   :  { %2193 = vmatprep.subr.bf16.mxu1 %v2837_v1  ;;  %v2404_v18 = vld [vmem:[#allocation5 + $0x50] ss:$12 sps:$4 sm:$0xff]   ;;  %v2398_v20 = vld [vmem:[#allocation5 + $0xac] ss:$12 sps:$4 sm:$0xff]   ;;  %v2405_v21 = vld [vmem:[#allocation5 + $0x68] ss:$12 sps:$4 sm:$0xff]  }
  0xf5   :  { %386 = vmatpush1.bf16.msra.mxu0 %v2382_v5  ;;  %v2397_v19 = vld [vmem:[#allocation5 + $0x90] ss:$12 sps:$4 sm:$0xff]   ;;  %v2400_v22 = vld [vmem:[#allocation5 + $0xa8] ss:$12 sps:$4 sm:$0xff]   ;;  %v2406_v24 = vld [vmem:[#allocation5 + $0x80] ss:$12 sps:$4 sm:$0xff]  }
  0xf6   :  { %387 = vmatprep.subr.bf16.mxu0 %v2383_v6  ;;  %v3086_v23 = vld [vmem:[#allocation2] sm:$0xf]  ;;  %v2407_v26 = vld [vmem:[#allocation5 + $0x98] ss:$12 sps:$4 sm:$0xff]   ;;  %vm2838_vm0 = vmmov 0   ;;  %v3102_v29 = vshrl.u32 %v240_v28, 7 }
  0xf7   :  { %2194 = vmatpush3.bf16.msra.mxu1 %v2402_v12  ;;  %v205_v25 = vpack.c.bf16 %v3086_v23, %v3086_v23  ;;  %v2408_v27 = vld [vmem:[#allocation5 + $0xb0] ss:$12 sps:$4 sm:$0xff]   ;;  %2207 = vmatprep.mubr.msk.bf16.mxu1 %vm2838_vm0, %v2837_v1  ;;  %v238_v31 = vld [vmem:[#allocation7] sm:$0x7]  ;;  %vm475_vm1 = vcmask 261120   ;;  %vm539_vm2 = vcmask 1040384  }
  0xf8   :  { %2195 = vmatprep.subr.bf16.mxu1 %v2837_v1  ;;  %v246_v30 = vsub.s32 1, %v3102_v29  ;;  %v242_v32 = vsub.s32 0, %v3102_v29  ;;  %v250_v47 = vsub.s32 2, %v3102_v29  ;;  %vm522_vm3 = vcmask 9216   ;;  %s2839_s12 = smov 96   ;;  %s2840_s20 = smov 32  }
  0xf9   :  { %388 = vmatpush1.bf16.msra.mxu0 %v2385_v7  ;;  %vm535_vm4 = vcmask 15360   ;;  %vm696_vm5 = vcmask 1041408   ;;  %vm1614_vm6 = vcmask 1043456  }
  0xfa   :  { %389 = vmatprep.subr.bf16.mxu0 %v2386_v8  ;;  %v247_v33 = vrot.slane %v238_v31, %v246_v30  ;;  %v243_v36 = vrot.slane %v238_v31, %v242_v32  ;;  %v251_v48 = vrot.slane %v238_v31, %v250_v47 }
  0xfb   :  { %2196 = vmatpush3.bf16.msra.mxu1 %v2403_v16 }
  0xfc   :  { %2197 = vmatprep.subr.bf16.mxu1 %v2837_v1 }
  0xfd   :  { %390 = vmatpush1.bf16.msra.mxu0 %v2388_v9 }
  0xfe   :  { %391 = vmatprep.subr.bf16.mxu0 %v2389_v11 }
  0xff   :  { %2198 = vmatpush3.bf16.msra.mxu1 %v2404_v18 }
 0x100   :  { %2199 = vmatprep.subr.bf16.mxu1 %v2837_v1 }
 0x101   :  { %392 = vmatpush1.bf16.msra.mxu0 %v2391_v13 }
 0x102   :  { %393 = vmatprep.subr.bf16.mxu0 %v2392_v14 }
 0x103   :  { %2200 = vmatpush3.bf16.msra.mxu1 %v2405_v21 }
 0x104   :  { %2201 = vmatprep.subr.bf16.mxu1 %v2837_v1 }
 0x105   :  { %394 = vmatpush1.bf16.msra.mxu0 %v2394_v15 }
 0x106   :  { %395 = vmatprep.subr.bf16.mxu0 %v2395_v17 }
 0x107   :  { %2202 = vmatpush3.bf16.msra.mxu1 %v2406_v24 }
 0x108   :  { %2203 = vmatprep.subr.bf16.mxu1 %v2837_v1 }
 0x109   :  { %396 = vmatpush1.bf16.msra.mxu0 %v2397_v19 }
 0x10a   :  { %397 = vmatprep.subr.bf16.mxu0 %v2398_v20 }
 0x10b   :  { %2204 = vmatpush3.bf16.msra.mxu1 %v2407_v26 }
 0x10c   :  { %2205 = vmatprep.subr.bf16.mxu1 %v2837_v1 }
 0x10d   :  { %398 = vmatpush1.bf16.msra.mxu0 %v2400_v22 }
 0x10e   :  { %2223 = vmatprep.subr.bf16.mxu0 %v2837_v1 }
 0x10f   :  { %2206 = vmatpush3.bf16.msra.mxu1 %v2408_v27 }
 0x110   :  { %416 = vmatmul.mubr.bf16.vlgmr.msra.gmra.mrb[0].mxu0 %v205_v25  ;;  %2211 = vmatprep.subr.bf16.mxu1 %v2837_v1 }
 0x111   :  { %2225 = vmatprep.mubr.msk.bf16.mxu0 %vm2838_vm0, %v2837_v1 }
 0x112   :  { %2208 = vmatmul.mubr.bf16.vlgmr.msra.gmra.mrb[0].mxu1 %v205_v25 }
 0x113   :  { %2213 = vmatprep.mubr.msk.bf16.mxu1 %vm2838_vm0, %v2837_v1 }
 0x1e3   :  { %v417_v34 = vpop.f32.mrb[0].mxu0 }
 0x1e4   :  { %v419_v35 = vpop.f32.mrb[1].mxu0  ;;  %v418_v41 = vadd.f32 %v417_v34, %v243_v36  ;;  %v2409_v34 = vld [vmem:[#allocation8] sm:$0xff]  }
 0x1e5   :  { %v420_v37 = vadd.f32 %v419_v35, %v247_v33  ;;  %v421_v38 = vpop.f32.mrb[2].mxu0  ;;  %v458_v49 = vpop.f32.mrb[0].mxu1  ;;  %v2410_v35 = vld [vmem:[#allocation8 + $0x8] sm:$0xff]  }
 0x1e6   :  { %v422_v39 = vpop.f32.mrb[3].mxu0  ;;  %v3120_v45 = vpack.c.bf16 %v418_v41, %v418_v41  ;;  %v459_v50 = vadd.f32 %v458_v49, %v251_v48  ;;  %v2209_v51 = vpop.f32.mrb[1].mxu1 }
 0x1e7   :  { %v3110_v40 = vpack.c.bf16 %v420_v37, %v420_v37  ;;  %v461_v52 = vpop.f32.mrb[2].mxu1 }
 0x1e8   :  { %v3126_v46 = vrot.slane %v3120_v45, 1  ;;  %v3135_v53 = vpack.c.bf16 %v459_v50, %v459_v50  ;;  %v2210_v54 = vpop.f32.mrb[3].mxu1 }
 0x1e9   :  { %v480_v42 = vsel %vm475_vm1, %v3110_v40, 0  ;;  %v3115_v43 = vrot.slane %v3110_v40, 1 }
 0x1ea   :  { %2212 = vmatpush3.bf16.xpose.msra.mxu1 %v480_v42  ;;  %v541_v55 = vsel %vm539_vm2, %v3135_v53, 0  ;;  %v3153_v18 = vrot.slane %v3135_v53, 1 }
 0x1eb   :  { %v591_v44 = vsel %vm475_vm1, %v3115_v43, 0  ;;  %2217 = vmatprep.subr.bf16.mxu1 %v2837_v1 }
 0x1ec   :  { %2224 = vmatpush3.bf16.xpose.msra.mxu0 %v591_v44  ;;  %v651_v21 = vsel %vm539_vm2, %v3153_v18, 0 }
 0x1ed   :  { %2235 = vmatprep.subr.bf16.mxu0 %v2837_v1 }
 0x1f1   :  { %2214 = vmatmul.mubr.msk.bf16.vlgmr.msra.gmra.mrb[4].mxu1 %vm475_vm1, %v3120_v45 }
 0x1f2   :  { %2219 = vmatprep.mubr.msk.bf16.mxu1 %vm2838_vm0, %v2837_v1  ;;  %2218 = vmatpush3.bf16.msra.mxu1 %v541_v55 }
 0x1f3   :  { %2226 = vmatmul.mubr.msk.bf16.vlgmr.msra.gmra.mrb[4].mxu0 %vm475_vm1, %v3126_v46  ;;  %2229 = vmatprep.subr.bf16.mxu1 %v2837_v1 }
 0x1f4   :  { %2239 = vmatprep.mubr.msk.bf16.mxu0 %vm2838_vm0, %v2837_v1  ;;  %2236 = vmatpush3.bf16.msra.mxu0 %v2409_v34 }
 0x1f5   :  { %2237 = vmatprep.subr.bf16.mxu0 %v2837_v1 }
 0x1f8   :  { %2238 = vmatpush3.bf16.msra.mxu0 %v2410_v35  ;;  %v2411_v35 = vld [vmem:[#allocation8 + $0x10] sm:$0xff]  }
 0x1f9   :  { %2249 = vmatprep.subr.bf16.mxu0 %v2837_v1 }
 0x2c4   :  { %v516_v56 = vpop.f32.mrb[4].mxu1 }
 0x2c5   :  { %v2215_v57 = vpop.f32.mrb[5].mxu1  ;;  %v523_v58 = vsel %vm522_vm3, %v516_v56, -inf }
 0x2c6   :  { %v627_v59 = vpop.f32.mrb[4].mxu0  ;;  %524 = vmax.xlane.f32.xlu0 %v523_v58  ;;  %v519_v60 = vpop.f32.mrb[6].mxu1 }
 0x2c7   :  { %v2216_v61 = vpop.f32.mrb[7].mxu1  ;;  %v2227_v62 = vpop.f32.mrb[5].mxu0  ;;  %v633_v3 = vsel %vm522_vm3, %v627_v59, -inf }
 0x2c8   :  { %v630_v63 = vpop.f32.mrb[6].mxu0 }
 0x2c9   :  { %v2228_v2 = vpop.f32.mrb[7].mxu0 }
 0x2ca   :  { %634 = vmax.xlane.f32.xlu0 %v633_v3 }
 0x2e0   :  { %761 = vrot.lane.b32.xlu0 %v3110_v40, %s2839_s12 }
 0x353   :  { %v525_v4 = vpop.xlane.xlu0 %524 }
 0x354   :  { %v526_v5 = vsub.f32 %v516_v56, %v525_v4 }
 0x356   :  { %v527_v6 = vmul.f32 1.442695, %v526_v5 }
 0x357   :  { %v635_v7 = vpop.xlane.xlu0 %634 }
 0x358   :  { %2457 = vpow2.f32 %v527_v6  ;;  %v636_v8 = vsub.f32 %v627_v59, %v635_v7 }
 0x35a   :  { %v637_v9 = vmul.f32 1.442695, %v636_v8 }
 0x35b   :  { %v762_v24 = vpop.permute.xlu0 %761 }
 0x35c   :  { %2459 = vpow2.f32 %v637_v9  ;;  %v767_v27 = vsel %vm475_vm1, %v762_v24, 0 }
 0x362   :  { %v2458_v10 = vpop.eup %2457 }
 0x363   :  { %v529_v11 = vsel %vm522_vm3, %v2458_v10, 0.0 }
 0x364   :  { %530 = vadd.xlane.f32.xlu1 %v529_v11 }
 0x366   :  { %v2460_v12 = vpop.eup %2459 }
 0x367   :  { %v639_v13 = vsel %vm522_vm3, %v2460_v12, 0.0 }
 0x368   :  { %640 = vadd.xlane.f32.xlu1 %v639_v13 }
 0x379   :  { %759 = vrot.lane.b32.xlu1 %v3120_v45, %s2839_s12 }
 0x37d   :  { %871 = vrot.lane.b32.xlu1 %v3115_v43, %s2839_s12 }
 0x381   :  { %869 = vrot.lane.b32.xlu1 %v3126_v46, %s2839_s12 }
 0x3f1   :  { %v531_v14 = vpop.xlane.xlu1 %530 }
 0x3f2   :  { %2461 = vrcp.f32 %v531_v14 }
 0x3f5   :  { %v641_v15 = vpop.xlane.xlu1 %640 }
 0x3f6   :  { %2463 = vrcp.f32 %v641_v15 }
 0x3f9   :  { %v760_v26 = vpop.permute.xlu1 %759 }
 0x3fc   :  { %v2462_v16 = vpop.eup %2461 }
 0x3fd   :  { %v533_v17 = vmul.f32 %v2462_v16, %v2458_v10  ;;  %v872_v28 = vpop.permute.xlu1 %871 }
 0x3fe   :  { %v877_v31 = vsel %vm475_vm1, %v872_v28, 0 }
 0x3ff   :  { %v534_v19 = vpack.c.bf16 %v533_v17, %v533_v17 }
 0x400   :  { %v2464_v20 = vpop.eup %2463 }
 0x401   :  { %2220 = vmatmul.mubr.msk.bf16.vlgmr.msra.gmra.mrb[8].mxu1 %vm535_vm4, %v534_v19  ;;  %v643_v22 = vmul.f32 %v2464_v20, %v2460_v12  ;;  %v870_v33 = vpop.permute.xlu1 %869 }
 0x402   :  { %2230 = vmatpush3.bf16.msra.mxu1 %v651_v21  ;;  %2231 = vmatprep.mubr.msk.bf16.mxu1 %vm2838_vm0, %v2837_v1 }
 0x403   :  { %2243 = vmatprep.subr.bf16.mxu1 %v2837_v1  ;;  %v644_v25 = vpack.c.bf16 %v643_v22, %v643_v22 }
 0x409   :  { %2232 = vmatmul.mubr.msk.bf16.vlgmr.msra.gmra.mrb[12].mxu1 %vm535_vm4, %v644_v25 }
 0x40a   :  { %2245 = vmatprep.mubr.msk.bf16.mxu1 %vm2838_vm0, %v2837_v1 }
 0x40b   :  { %2244 = vmatpush3.bf16.xpose.msra.mxu1 %v767_v27 }
 0x40c   :  { %2255 = vmatprep.subr.bf16.mxu1 %v2837_v1 }
 0x412   :  { %2246 = vmatmul.mubr.msk.bf16.vlgmr.msra.gmra.mrb[16].mxu1 %vm475_vm1, %v760_v26 }
 0x413   :  { %2256 = vmatpush3.bf16.xpose.msra.mxu1 %v877_v31  ;;  %2257 = vmatprep.mubr.msk.bf16.mxu1 %vm2838_vm0, %v2837_v1 }
 0x414   :  { %2275 = vmatprep.subr.bf16.mxu1 %v2837_v1 }
 0x41a   :  { %2258 = vmatmul.mubr.msk.bf16.vlgmr.msra.gmra.mrb[20].mxu1 %vm475_vm1, %v870_v33 }
 0x41b   :  { %2277 = vmatprep.mubr.msk.bf16.mxu1 %vm2838_vm0, %v2837_v1 }
 0x4d4   :  { %v577_v36 = vpop.f32.mrb[8].mxu1 }
 0x4d5   :  { %v2221_v37 = vpop.f32.mrb[9].mxu1 }
 0x4d6   :  { %v580_v38 = vpop.f32.mrb[10].mxu1 }
 0x4d7   :  { %v2222_v39 = vpop.f32.mrb[11].mxu1 }
 0x4dc   :  { %v687_v41 = vpop.f32.mrb[12].mxu1 }
 0x4dd   :  { %v694_v42 = vrot.slane %v687_v41, 6  ;;  %v2233_v44 = vpop.f32.mrb[13].mxu1 }
 0x4de   :  { %v690_v47 = vpop.f32.mrb[14].mxu1 }
 0x4df   :  { %v697_v48 = vsel %vm696_vm5, %v577_v36, %v694_v42  ;;  %v2234_v49 = vpop.f32.mrb[15].mxu1  ;;  %v2412_v36 = vld [vmem:[#allocation8 + $0x18] sm:$0xff]  }
 0x4e0   :  { %v698_v50 = vpack.c.bf16 %v697_v48, %v697_v48 }
 0x4e2   :  { %2240 = vmatmul.mubr.msk.bf16.vlgmr.msra.gmra.mrb[8].mxu0 %vm475_vm1, %v698_v50 }
 0x4e3   :  { %2251 = vmatprep.mubr.msk.bf16.mxu0 %vm2838_vm0, %v2837_v1 }
 0x4e5   :  { %v803_v51 = vpop.f32.mrb[16].mxu1 }
 0x4e6   :  { %v2247_v52 = vpop.f32.mrb[17].mxu1  ;;  %v809_v54 = vsel %vm522_vm3, %v803_v51, -inf }
 0x4e7   :  { %810 = vmax.xlane.f32.xlu0 %v809_v54  ;;  %v806_v55 = vpop.f32.mrb[18].mxu1 }
 0x4e8   :  { %v2248_v56 = vpop.f32.mrb[19].mxu1 }
 0x4ed   :  { %v913_v57 = vpop.f32.mrb[20].mxu1 }
 0x4ee   :  { %v2259_v58 = vpop.f32.mrb[21].mxu1  ;;  %v919_v59 = vsel %vm522_vm3, %v913_v57, -inf }
 0x4ef   :  { %920 = vmax.xlane.f32.xlu1 %v919_v59  ;;  %v916_v60 = vpop.f32.mrb[22].mxu1 }
 0x4f0   :  { %v2260_v61 = vpop.f32.mrb[23].mxu1 }
 0x500   :  { %931 = vrot.lane.b32.xlu1 %v3153_v18, %s2839_s12 }
 0x504   :  { %1046 = vrot.lane.b32.xlu1 %v3110_v40, %s2821_s1 }
 0x508   :  { %1044 = vrot.lane.b32.xlu1 %v3120_v45, %s2821_s1 }
 0x50c   :  { %1154 = vrot.lane.b32.xlu1 %v3126_v46, %s2821_s1 }
 0x574   :  { %v811_v62 = vpop.xlane.xlu0 %810 }
 0x575   :  { %v812_v63 = vsub.f32 %v803_v51, %v811_v62 }
 0x577   :  { %v813_v2 = vmul.f32 1.442695, %v812_v63 }
 0x579   :  { %2465 = vpow2.f32 %v813_v2 }
 0x57c   :  { %v921_v3 = vpop.xlane.xlu1 %920 }
 0x57d   :  { %v922_v4 = vsub.f32 %v913_v57, %v921_v3 }
 0x57f   :  { %v923_v5 = vmul.f32 1.442695, %v922_v4 }
 0x580   :  { %v932_v6 = vpop.permute.xlu1 %931 }
 0x581   :  { %2467 = vpow2.f32 %v923_v5  ;;  %v937_v22 = vsel %vm539_vm2, %v932_v6, 0 }
 0x583   :  { %v2466_v7 = vpop.eup %2465 }
 0x584   :  { %v1047_v8 = vpop.permute.xlu1 %1046  ;;  %v815_v9 = vsel %vm522_vm3, %v2466_v7, 0.0 }
 0x585   :  { %v1052_v10 = vsel %vm475_vm1, %v1047_v8, 0  ;;  %816 = vadd.xlane.f32.xlu0 %v815_v9 }
 0x586   :  { %2276 = vmatpush3.bf16.xpose.msra.mxu1 %v1052_v10 }
 0x587   :  { %2281 = vmatprep.subr.bf16.mxu1 %v2837_v1 }
 0x588   :  { %v1045_v12 = vpop.permute.xlu1 %1044 }
 0x58b   :  { %v2468_v11 = vpop.eup %2467 }
 0x58c   :  { %v925_v13 = vsel %vm522_vm3, %v2468_v11, 0.0  ;;  %v1155_v60 = vpop.permute.xlu1 %1154 }
 0x58d   :  { %926 = vadd.xlane.f32.xlu0 %v925_v13  ;;  %2278 = vmatmul.mubr.msk.bf16.vlgmr.msra.gmra.mrb[24].mxu1 %vm475_vm1, %v1045_v12 }
 0x58e   :  { %2283 = vmatprep.mubr.msk.bf16.mxu1 %vm2838_vm0, %v2837_v1 }
 0x5a3   :  { %821 = vrot.lane.b32.xlu0 %v3135_v53, %s2839_s12 }
 0x5a7   :  { %1156 = vrot.lane.b32.xlu0 %v3115_v43, %s2821_s1 }
 0x612   :  { %v817_v14 = vpop.xlane.xlu0 %816 }
 0x613   :  { %2469 = vrcp.f32 %v817_v14 }
 0x61a   :  { %v927_v15 = vpop.xlane.xlu0 %926 }
 0x61b   :  { %2471 = vrcp.f32 %v927_v15 }
 0x61d   :  { %v2470_v16 = vpop.eup %2469 }
 0x61e   :  { %v819_v17 = vmul.f32 %v2470_v16, %v2466_v7  ;;  %v822_v19 = vpop.permute.xlu0 %821 }
 0x61f   :  { %v827_v20 = vsel %vm539_vm2, %v822_v19, 0 }
 0x620   :  { %2250 = vmatpush3.bf16.msra.mxu0 %v827_v20  ;;  %v820_v21 = vpack.c.bf16 %v819_v17, %v819_v17 }
 0x621   :  { %2261 = vmatprep.subr.bf16.mxu0 %v2837_v1 }
 0x622   :  { %v1157_v37 = vpop.permute.xlu0 %1156 }
 0x623   :  { %2252 = vmatmul.mubr.msk.bf16.vlgmr.msra.gmra.mrb[12].mxu0 %vm535_vm4, %v820_v21  ;;  %v1162_v59 = vsel %vm475_vm1, %v1157_v37, 0 }
 0x624   :  { %2262 = vmatpush3.bf16.msra.mxu0 %v937_v22  ;;  %2263 = vmatprep.mubr.msk.bf16.mxu0 %vm2838_vm0, %v2837_v1 }
 0x625   :  { %v2472_v24 = vpop.eup %2471  ;;  %2267 = vmatprep.subr.bf16.mxu0 %v2837_v1 }
 0x626   :  { %v929_v25 = vmul.f32 %v2472_v24, %v2468_v11 }
 0x628   :  { %v930_v26 = vpack.c.bf16 %v929_v25, %v929_v25  ;;  %v2413_v25 = vld [vmem:[#allocation8 + $0x20] sm:$0xff]  }
 0x62b   :  { %2264 = vmatmul.mubr.msk.bf16.vlgmr.msra.gmra.mrb[16].mxu0 %vm535_vm4, %v930_v26  ;;  %v2414_v26 = vld [vmem:[#allocation8 + $0x28] sm:$0xff]  }
 0x62c   :  { %2271 = vmatprep.mubr.msk.bf16.mxu0 %vm2838_vm0, %v2837_v1  ;;  %2268 = vmatpush3.bf16.msra.mxu0 %v2411_v35 }
 0x62d   :  { %2269 = vmatprep.subr.bf16.mxu0 %v2837_v1 }
 0x630   :  { %2270 = vmatpush3.bf16.msra.mxu0 %v2412_v36 }
 0x631   :  { %2287 = vmatprep.subr.bf16.mxu0 %v2837_v1 }
 0x660   :  { %v1088_v27 = vpop.f32.mrb[24].mxu1 }
 0x661   :  { %v2279_v28 = vpop.f32.mrb[25].mxu1  ;;  %v1094_v31 = vsel %vm522_vm3, %v1088_v27, -inf }
 0x662   :  { %1095 = vmax.xlane.f32.xlu0 %v1094_v31  ;;  %v1091_v33 = vpop.f32.mrb[26].mxu1 }
 0x663   :  { %v2280_v34 = vpop.f32.mrb[27].mxu1 }
 0x6ef   :  { %v1096_v38 = vpop.xlane.xlu0 %1095 }
 0x6f0   :  { %v1097_v39 = vsub.f32 %v1088_v27, %v1096_v38 }
 0x6f2   :  { %v1098_v41 = vmul.f32 1.442695, %v1097_v39 }
 0x6f4   :  { %2473 = vpow2.f32 %v1098_v41 }
 0x6f6   :  { %v863_v42 = vpop.f32.mrb[12].mxu0 }
 0x6f7   :  { %v2253_v44 = vpop.f32.mrb[13].mxu0 }
 0x6f8   :  { %v866_v47 = vpop.f32.mrb[14].mxu0 }
 0x6f9   :  { %v2254_v48 = vpop.f32.mrb[15].mxu0 }
 0x6fe   :  { %v2474_v49 = vpop.eup %2473  ;;  %v973_v50 = vpop.f32.mrb[16].mxu0 }
 0x6ff   :  { %v980_v51 = vrot.slane %v973_v50, 6  ;;  %v2265_v52 = vpop.f32.mrb[17].mxu0  ;;  %v1100_v54 = vsel %vm522_vm3, %v2474_v49, 0.0 }
 0x700   :  { %v976_v55 = vpop.f32.mrb[18].mxu0  ;;  %1101 = vadd.xlane.f32.xlu0 %v1100_v54 }
 0x701   :  { %v982_v56 = vsel %vm696_vm5, %v863_v42, %v980_v51  ;;  %v2266_v57 = vpop.f32.mrb[19].mxu0 }
 0x702   :  { %v983_v58 = vpack.c.bf16 %v982_v56, %v982_v56 }
 0x704   :  { %2272 = vmatmul.mubr.msk.bf16.vlgmr.msra.gmra.mrb[8].mxu0 %vm475_vm1, %v983_v58 }
 0x705   :  { %2288 = vmatpush3.bf16.xpose.msra.mxu0 %v1162_v59  ;;  %2289 = vmatprep.mubr.msk.bf16.mxu0 %vm2838_vm0, %v2837_v1 }
 0x706   :  { %2299 = vmatprep.subr.bf16.mxu0 %v2837_v1 }
 0x70c   :  { %2290 = vmatmul.mubr.msk.bf16.vlgmr.msra.gmra.mrb[20].mxu0 %vm475_vm1, %v1155_v60 }
 0x70d   :  { %2303 = vmatprep.mubr.msk.bf16.mxu0 %vm2838_vm0, %v2837_v1  ;;  %2300 = vmatpush3.bf16.msra.mxu0 %v2413_v25 }
 0x70e   :  { %2301 = vmatprep.subr.bf16.mxu0 %v2837_v1 }
 0x711   :  { %2302 = vmatpush3.bf16.msra.mxu0 %v2414_v26 }
 0x712   :  { %2313 = vmatprep.subr.bf16.mxu0 %v2837_v1 }
 0x7df   :  { %v1198_v61 = vpop.f32.mrb[20].mxu0 }
 0x7e0   :  { %v2291_v62 = vpop.f32.mrb[21].mxu0  ;;  %v1204_v63 = vsel %vm522_vm3, %v1198_v61, -inf }
 0x7e1   :  { %1205 = vmax.xlane.f32.xlu1 %v1204_v63  ;;  %v1201_v2 = vpop.f32.mrb[22].mxu0 }
 0x7e2   :  { %v2292_v3 = vpop.f32.mrb[23].mxu0 }
 0x7f2   :  { %1216 = vrot.lane.b32.xlu1 %v3153_v18, %s2821_s1 }
 0x7f6   :  { %1331 = vrot.lane.b32.xlu1 %v3110_v40, %s2840_s20  ;;  %v1102_v40 = vpop.xlane.xlu0 %1101 }
 0x7fa   :  { %1329 = vrot.lane.b32.xlu1 %v3120_v45, %s2840_s20 }
 0x7fe   :  { %1439 = vrot.lane.b32.xlu1 %v3126_v46, %s2840_s20 }
 0x86e   :  { %v1206_v4 = vpop.xlane.xlu1 %1205 }
 0x86f   :  { %v1207_v5 = vsub.f32 %v1198_v61, %v1206_v4 }
 0x871   :  { %v1208_v6 = vmul.f32 1.442695, %v1207_v5 }
 0x872   :  { %v1217_v12 = vpop.permute.xlu1 %1216 }
 0x873   :  { %2475 = vpow2.f32 %v1208_v6  ;;  %v1222_v14 = vsel %vm539_vm2, %v1217_v12, 0 }
 0x874   :  { %2477 = vrcp.f32 %v1102_v40 }
 0x876   :  { %v1332_v17 = vpop.permute.xlu1 %1331 }
 0x877   :  { %v1337_v19 = vsel %vm475_vm1, %v1332_v17, 0 }
 0x87a   :  { %v1330_v21 = vpop.permute.xlu1 %1329 }
 0x87d   :  { %v2476_v7 = vpop.eup %2475 }
 0x87e   :  { %v1210_v8 = vsel %vm522_vm3, %v2476_v7, 0.0  ;;  %v2478_v45 = vpop.eup %2477  ;;  %v1440_v24 = vpop.permute.xlu1 %1439 }
 0x87f   :  { %1211 = vadd.xlane.f32.xlu0 %v1210_v8  ;;  %v1104_v46 = vmul.f32 %v2478_v45, %v2474_v49 }
 0x881   :  { %v1105_v13 = vpack.c.bf16 %v1104_v46, %v1104_v46 }
 0x895   :  { %1106 = vrot.lane.b32.xlu0 %v3135_v53, %s2821_s1  ;;  %s2841_s1 = smov [#allocation23]  }
 0x896   :  { %s2011_s6 = sshll.u32 %s2841_s1, 4  ;;  %s2012_s6 = int_to_ptr.vmem [resolvable:$true] %s2011_s6 }
 0x897   :  { %s2779_s7 = scalar_lea.vmem %s2012_s6, 64  ;;  %p2784_p7 = scmp.lt.s32.totalorder %s2012_s6, %s2012_s6 }
 0x898   :  { %p2780_p6 = scmp.ne.s32.totalorder %s2012_s6, %s2779_s7  ;;  %p2785_p8 = scmp.lt.s32.totalorder %s2779_s7, %s2779_s7 }
 0x899   :  { %1441 = vrot.lane.b32.xlu0 %v3115_v43, %s2840_s20 }
 0x89a   :  { %p2786_p9 = por %p2785_p8, %p2784_p7 }
 0x89c   :  { %p2787_p10 = pnand %p2786_p9, %p2780_p6 }
 0x90c   :  { %v1212_v9 = vpop.xlane.xlu0 %1211 }
 0x90d   :  { %2479 = vrcp.f32 %v1212_v9 }
 0x910   :  { %v1107_v10 = vpop.permute.xlu0 %1106 }
 0x911   :  { %v1112_v11 = vsel %vm539_vm2, %v1107_v10, 0  ;;  %v2415_v10 = vld [vmem:[#allocation8 + $0x30] sm:$0xff]  }
 0x912   :  { %2282 = vmatpush3.bf16.msra.mxu1 %v1112_v11  ;;  %v2416_v11 = vld [vmem:[#allocation8 + $0x38] sm:$0xff]  }
 0x913   :  { %2293 = vmatprep.subr.bf16.mxu1 %v2837_v1 }
 0x914   :  { %v1442_v20 = vpop.permute.xlu0 %1441 }
 0x915   :  { %2284 = vmatmul.mubr.msk.bf16.vlgmr.msra.gmra.mrb[28].mxu1 %vm535_vm4, %v1105_v13  ;;  %v1447_v22 = vsel %vm475_vm1, %v1442_v20, 0 }
 0x916   :  { %2294 = vmatpush3.bf16.msra.mxu1 %v1222_v14  ;;  %2295 = vmatprep.mubr.msk.bf16.mxu1 %vm2838_vm0, %v2837_v1 }
 0x917   :  { %v2480_v43 = vpop.eup %2479  ;;  %2307 = vmatprep.subr.bf16.mxu1 %v2837_v1 }
 0x918   :  { %v1214_v15 = vmul.f32 %v2480_v43, %v2476_v7 }
 0x91a   :  { %v1215_v16 = vpack.c.bf16 %v1214_v15, %v1214_v15 }
 0x91d   :  { %2296 = vmatmul.mubr.msk.bf16.vlgmr.msra.gmra.mrb[32].mxu1 %vm535_vm4, %v1215_v16 }
 0x91e   :  { %2309 = vmatprep.mubr.msk.bf16.mxu1 %vm2838_vm0, %v2837_v1 }
 0x91f   :  { %2308 = vmatpush3.bf16.xpose.msra.mxu1 %v1337_v19 }
 0x920   :  { %2319 = vmatprep.subr.bf16.mxu1 %v2837_v1 }
 0x926   :  { %2310 = vmatmul.mubr.msk.bf16.vlgmr.msra.gmra.mrb[36].mxu1 %vm475_vm1, %v1330_v21 }
 0x927   :  { %2320 = vmatpush3.bf16.xpose.msra.mxu1 %v1447_v22  ;;  %2321 = vmatprep.mubr.msk.bf16.mxu1 %vm2838_vm0, %v2837_v1 }
 0x92e   :  { %2322 = vmatmul.mubr.msk.bf16.vlgmr.msra.gmra.mrb[40].mxu1 %vm475_vm1, %v1440_v24  ;;  %v2050_v24 = vld [vmem:[#allocation10] ss:$0 sm:$0xff] }
 0x92f   :  { %1786 = vmatprep.mubr.bf16.mxu1 %v2836_v0  ;;  %v474_v25 = vadd.f32 %v2050_v24, %v3086_v23 }
 0x9e8   :  { %v1148_v27 = vpop.f32.mrb[28].mxu1 }
 0x9e9   :  { %v2285_v28 = vpop.f32.mrb[29].mxu1 }
 0x9ea   :  { %v1151_v31 = vpop.f32.mrb[30].mxu1 }
 0x9eb   :  { %v2286_v33 = vpop.f32.mrb[31].mxu1 }
 0x9f0   :  { %v1258_v34 = vpop.f32.mrb[32].mxu1 }
 0x9f1   :  { %v1265_v35 = vrot.slane %v1258_v34, 6  ;;  %v2297_v36 = vpop.f32.mrb[33].mxu1  ;;  %v2417_v34 = vld [vmem:[#allocation14] ss:$8 sps:$4 sm:$0xff]  }
 0x9f2   :  { %v1261_v37 = vpop.f32.mrb[34].mxu1  ;;  %v2422_v36 = vld [vmem:[#allocation14 + $0x14] ss:$8 sps:$4 sm:$0xff]  }
 0x9f3   :  { %v1267_v38 = vsel %vm696_vm5, %v1148_v27, %v1265_v35  ;;  %v2298_v39 = vpop.f32.mrb[35].mxu1  ;;  %v2419_v35 = vld [vmem:[#allocation14 + $0x4] ss:$8 sps:$4 sm:$0xff]   ;;  %v2420_v37 = vld [vmem:[#allocation14 + $0x10] ss:$8 sps:$4 sm:$0xff]  }
 0x9f4   :  { %v1268_v0 = vpack.c.bf16 %v1267_v38, %v1267_v38  ;;  %1754 = vmatprep.subr.bf16.mxu1 %v2419_v35  ;;  %v2425_v38 = vld [vmem:[#allocation14 + $0x24] ss:$8 sps:$4 sm:$0xff]   ;;  %v2423_v39 = vld [vmem:[#allocation14 + $0x20] ss:$8 sps:$4 sm:$0xff]  }
 0x9f5   :  { %1755 = vmatpush1.bf16.msra.mxu1 %v2417_v34  ;;  %v2097_v34 = vld [vmem:[#allocation19] ss:$0 sm:$0xff] }
 0x9f6   :  { %2304 = vmatmul.mubr.msk.bf16.vlgmr.msra.gmra.mrb[8].mxu0 %vm475_vm1, %v1268_v0  ;;  %1756 = vmatprep.subr.bf16.mxu1 %v2422_v36 }
 0x9f7   :  { %2315 = vmatprep.mubr.msk.bf16.mxu0 %vm2838_vm0, %v2837_v1 }
 0x9f9   :  { %v1373_v41 = vpop.f32.mrb[36].mxu1  ;;  %1757 = vmatpush1.bf16.msra.mxu1 %v2420_v37 }
 0x9fa   :  { %v2311_v42 = vpop.f32.mrb[37].mxu1  ;;  %v1379_v44 = vsel %vm522_vm3, %v1373_v41, -inf  ;;  %1758 = vmatprep.subr.bf16.mxu1 %v2425_v38 }
 0x9fb   :  { %1380 = vmax.xlane.f32.xlu0 %v1379_v44  ;;  %v1376_v47 = vpop.f32.mrb[38].mxu1 }
 0x9fc   :  { %v2312_v48 = vpop.f32.mrb[39].mxu1  ;;  %v2428_v47 = vld [vmem:[#allocation14 + $0x34] ss:$8 sps:$4 sm:$0xff]  }
 0x9fd   :  { %1759 = vmatpush1.bf16.msra.mxu1 %v2423_v39  ;;  %v2426_v48 = vld [vmem:[#allocation14 + $0x30] ss:$8 sps:$4 sm:$0xff]  }
 0x9fe   :  { %1760 = vmatprep.subr.bf16.mxu1 %v2428_v47 }
 0xa01   :  { %v1483_v49 = vpop.f32.mrb[40].mxu1  ;;  %1761 = vmatpush1.bf16.msra.mxu1 %v2426_v48 }
 0xa02   :  { %v2323_v50 = vpop.f32.mrb[41].mxu1  ;;  %v1489_v51 = vsel %vm522_vm3, %v1483_v49, -inf }
 0xa03   :  { %1490 = vmax.xlane.f32.xlu1 %v1489_v51  ;;  %v1486_v52 = vpop.f32.mrb[42].mxu1  ;;  %v2429_v50 = vld [vmem:[#allocation14 + $0x40] ss:$8 sps:$4 sm:$0xff]   ;;  %v2434_v51 = vld [vmem:[#allocation14 + $0x54] ss:$8 sps:$4 sm:$0xff]  }
 0xa04   :  { %v2324_v54 = vpop.f32.mrb[43].mxu1  ;;  %v2432_v52 = vld [vmem:[#allocation14 + $0x50] ss:$8 sps:$4 sm:$0xff]  }
 0xa05   :  { %v2437_v54 = vld [vmem:[#allocation14 + $0x64] ss:$8 sps:$4 sm:$0xff]  }
 0xa14   :  { %1501 = vrot.lane.b32.xlu1 %v3153_v18, %s2840_s20 }
 0xa88   :  { %v1381_v55 = vpop.xlane.xlu0 %1380 }
 0xa89   :  { %v1382_v56 = vsub.f32 %v1373_v41, %v1381_v55  ;;  %v2435_v55 = vld [vmem:[#allocation14 + $0x60] ss:$8 sps:$4 sm:$0xff]  }
 0xa8b   :  { %v1383_v57 = vmul.f32 1.442695, %v1382_v56  ;;  %v2440_v56 = vld [vmem:[#allocation14 + $0x74] ss:$8 sps:$4 sm:$0xff]  }
 0xa8d   :  { %2481 = vpow2.f32 %v1383_v57  ;;  %v2438_v57 = vld [vmem:[#allocation14 + $0x70] ss:$8 sps:$4 sm:$0xff]  }
 0xa90   :  { %v1491_v58 = vpop.xlane.xlu1 %1490 }
 0xa91   :  { %v1492_v59 = vsub.f32 %v1483_v49, %v1491_v58  ;;  %v2431_v49 = vld [vmem:[#allocation14 + $0x44] ss:$8 sps:$4 sm:$0xff]  }
 0xa92   :  { %1762 = vmatprep.subr.bf16.mxu1 %v2431_v49  ;;  %v2441_v58 = vld [vmem:[#allocation17 + $0x40] sm:$0xff]  }
 0xa93   :  { %v1493_v60 = vmul.f32 1.442695, %v1492_v59  ;;  %1763 = vmatpush1.bf16.msra.mxu1 %v2429_v50  ;;  %v2442_v59 = vld [vmem:[#allocation17] sm:$0xff]  }
 0xa94   :  { %v1502_v8 = vpop.permute.xlu1 %1501  ;;  %1764 = vmatprep.subr.bf16.mxu1 %v2434_v51  ;;  %v2114_v50 = vld [vmem:[#allocation20] ss:$0 sm:$0xff] }
 0xa95   :  { %2483 = vpow2.f32 %v1493_v60  ;;  %v1507_v45 = vsel %vm539_vm2, %v1502_v8, 0  ;;  %v2443_v60 = vld [vmem:[#allocation17 + $0x48] sm:$0xff]  }
 0xa97   :  { %v2482_v61 = vpop.eup %2481  ;;  %1765 = vmatpush1.bf16.msra.mxu1 %v2432_v52  ;;  %v2115_v52 = vld [vmem:[#allocation22] ss:$0 sm:$0xff] }
 0xa98   :  { %v1385_v62 = vsel %vm522_vm3, %v2482_v61, 0.0  ;;  %1766 = vmatprep.subr.bf16.mxu1 %v2437_v54 }
 0xa99   :  { %1386 = vadd.xlane.f32.xlu0 %v1385_v62  ;;  %v2445_v62 = vld [vmem:[#allocation17 + $0x50] sm:$0xff]  }
 0xa9b   :  { %1767 = vmatpush1.bf16.msra.mxu1 %v2435_v55 }
 0xa9c   :  { %1768 = vmatprep.subr.bf16.mxu1 %v2440_v56 }
 0xa9f   :  { %v2484_v63 = vpop.eup %2483  ;;  %1769 = vmatpush1.bf16.msra.mxu1 %v2438_v57 }
 0xaa0   :  { %v1495_v2 = vsel %vm522_vm3, %v2484_v63, 0.0 }
 0xaa1   :  { %1496 = vadd.xlane.f32.xlu0 %v1495_v2  ;;  %v2447_v2 = vld [vmem:[#allocation17 + $0x58] sm:$0xff]  }
 0xab7   :  { %1391 = vrot.lane.b32.xlu0 %v3135_v53, %s2840_s20 }
 0xb26   :  { %v1387_v18 = vpop.xlane.xlu0 %1386 }
 0xb27   :  { %2485 = vrcp.f32 %v1387_v18  ;;  %v2448_v18 = vld [vmem:[#allocation17 + $0x18] sm:$0xff]  }
 0xb2e   :  { %v1497_v3 = vpop.xlane.xlu0 %1496 }
 0xb2f   :  { %2487 = vrcp.f32 %v1497_v3  ;;  %v2449_v3 = vld [vmem:[#allocation17 + $0x60] sm:$0xff]  }
 0xb31   :  { %v2486_v4 = vpop.eup %2485 }
 0xb32   :  { %v1389_v5 = vmul.f32 %v2486_v4, %v2482_v61  ;;  %v1392_v6 = vpop.permute.xlu0 %1391  ;;  %v2444_v61 = vld [vmem:[#allocation17 + $0x8] sm:$0xff]   ;;  %v2450_v4 = vld [vmem:[#allocation17 + $0x20] sm:$0xff]  }
 0xb33   :  { %v1397_v7 = vsel %vm539_vm2, %v1392_v6, 0  ;;  %v2452_v6 = vld [vmem:[#allocation17 + $0x28] sm:$0xff]  }
 0xb34   :  { %2314 = vmatpush3.bf16.msra.mxu0 %v1397_v7  ;;  %v1390_v40 = vpack.c.bf16 %v1389_v5, %v1389_v5  ;;  %v2451_v5 = vld [vmem:[#allocation17 + $0x68] sm:$0xff]  }
 0xb35   :  { %2325 = vmatprep.subr.bf16.mxu0 %v2837_v1 }
 0xb37   :  { %2316 = vmatmul.mubr.msk.bf16.vlgmr.msra.gmra.mrb[24].mxu0 %vm535_vm4, %v1390_v40 }
 0xb38   :  { %2326 = vmatpush3.bf16.msra.mxu0 %v1507_v45  ;;  %2327 = vmatprep.mubr.msk.bf16.mxu0 %vm2838_vm0, %v2837_v1 }
 0xb39   :  { %v2488_v53 = vpop.eup %2487  ;;  %2331 = vmatprep.subr.bf16.mxu0 %v2837_v1 }
 0xb3a   :  { %v1499_v9 = vmul.f32 %v2488_v53, %v2484_v63  ;;  %v2446_v63 = vld [vmem:[#allocation17 + $0x10] sm:$0xff]   ;;  %v2079_v53 = vld [vmem:[#allocation11] ss:$0 sm:$0xff] }
 0xb3c   :  { %v1500_v46 = vpack.c.bf16 %v1499_v9, %v1499_v9 }
 0xb3f   :  { %2328 = vmatmul.mubr.msk.bf16.vlgmr.msra.gmra.mrb[28].mxu0 %vm535_vm4, %v1500_v46  ;;  %v2080_v46 = vld [vmem:[#allocation13] ss:$0 sm:$0xff] }
 0xb40   :  { %2335 = vmatprep.mubr.msk.bf16.mxu0 %vm2838_vm0, %v2837_v1  ;;  %2332 = vmatpush3.bf16.msra.mxu0 %v2415_v10 }
 0xb41   :  { %2333 = vmatprep.subr.bf16.mxu0 %v2837_v1 }
 0xb44   :  { %2334 = vmatpush3.bf16.msra.mxu0 %v2416_v11 }
 0xb45   :  { %2169 = vmatprep.subr.bf16.mxu0 %v2441_v58 }
 0xc0a   :  { %v1433_v12 = vpop.f32.mrb[24].mxu0 }
 0xc0b   :  { %v2317_v13 = vpop.f32.mrb[25].mxu0 }
 0xc0c   :  { %v1436_v14 = vpop.f32.mrb[26].mxu0  ;;  %v2453_v13 = vld [vmem:[#allocation17 + $0x70] sm:$0xff]  }
 0xc0d   :  { %v2318_v43 = vpop.f32.mrb[27].mxu0  ;;  %v2454_v14 = vld [vmem:[#allocation17 + $0x30] sm:$0xff]  }
 0xc0e   :  { %v2455_v43 = vld [vmem:[#allocation17 + $0x78] sm:$0xff]  }
 0xc12   :  { %v1543_v15 = vpop.f32.mrb[28].mxu0 }
 0xc13   :  { %v1550_v16 = vrot.slane %v1543_v15, 6  ;;  %v2329_v17 = vpop.f32.mrb[29].mxu0  ;;  %v2456_v15 = vld [vmem:[#allocation17 + $0x38] sm:$0xff]  }
 0xc14   :  { %v1546_v19 = vpop.f32.mrb[30].mxu0 }
 0xc15   :  { %v1552_v20 = vsel %vm696_vm5, %v1433_v12, %v1550_v16  ;;  %v2330_v21 = vpop.f32.mrb[31].mxu0  ;;  %v1662_v16 = vld [vmem:[#allocation16] sm:$0x3] }
 0xc16   :  { %v1553_v22 = vpack.c.bf16 %v1552_v20, %v1552_v20  ;;  %v1667_v17 = vrot.slane %v1662_v16, %v242_v32  ;;  %v1671_v19 = vrot.slane %v1662_v16, %v246_v30 }
 0xc18   :  { %2336 = vmatmul.mubr.msk.bf16.vlgmr.msra.gmra.mrb[8].mxu0 %vm475_vm1, %v1553_v22 }
 0xc19   :  { %2170 = vmatpush3.bf16.msra.mxu0 %v2442_v59 }
 0xc1a   :  { %2171 = vmatprep.subr.bf16.mxu0 %v2443_v60 }
 0xc1d   :  { %2172 = vmatpush3.bf16.msra.mxu0 %v2444_v61 }
 0xc1e   :  { %2173 = vmatprep.subr.bf16.mxu0 %v2445_v62 }
 0xc21   :  { %2174 = vmatpush3.bf16.msra.mxu0 %v2446_v63 }
 0xc22   :  { %2175 = vmatprep.subr.bf16.mxu0 %v2447_v2 }
 0xc25   :  { %2176 = vmatpush3.bf16.msra.mxu0 %v2448_v18 }
 0xc26   :  { %2177 = vmatprep.subr.bf16.mxu0 %v2449_v3 }
 0xc29   :  { %2178 = vmatpush3.bf16.msra.mxu0 %v2450_v4 }
 0xc2a   :  { %2179 = vmatprep.subr.bf16.mxu0 %v2451_v5 }
 0xc2d   :  { %2180 = vmatpush3.bf16.msra.mxu0 %v2452_v6 }
 0xc2e   :  { %2181 = vmatprep.subr.bf16.mxu0 %v2453_v13 }
 0xc31   :  { %2182 = vmatpush3.bf16.msra.mxu0 %v2454_v14 }
 0xc32   :  { %2183 = vmatprep.subr.bf16.mxu0 %v2455_v43 }
 0xc35   :  { %2184 = vmatpush3.bf16.msra.mxu0 %v2456_v15 }
 0xceb   :  { %v1607_v1 = vpop.f32.mrb[8].mxu0 }
 0xcec   :  { %v2339_v26 = vadd.f32 %v1607_v1, %v474_v25  ;;  %v2337_v27 = vpop.f32.mrb[9].mxu0 }
 0xced   :  { %v1610_v28 = vpop.f32.mrb[10].mxu0 }
 0xcee   :  { %v2338_v31 = vpop.f32.mrb[11].mxu0  ;;  %v1615_v33 = vsel %vm1614_vm6, %v2339_v26, 0.0 }
 0xcef   :  { %1616 = vadd.xlane.f32.xlu1 %v1615_v33 }
 0xd7c   :  { %v1617_v23 = vpop.xlane.xlu1 %1616 }
 0xd7d   :  { %v1619_v0 = vmul.f32 0.0078125, %v1617_v23 }
 0xd7f   :  { %v1620_v41 = vsub.f32 %v2339_v26, %v1619_v0 }
 0xd81   :  { %v1621_v42 = vmul.f32 %v1620_v41, %v1620_v41 }
 0xd83   :  { %v1622_v44 = vsel %vm1614_vm6, %v1621_v42, 0.0 }
 0xd84   :  { %1623 = vadd.xlane.f32.xlu0 %v1622_v44 }
 0xe11   :  { %v1624_v7 = vpop.xlane.xlu0 %1623 }
 0xe12   :  { %v1625_v8 = vmul.f32 0.0078125, %v1624_v7 }
 0xe14   :  { %v1626_v40 = vadd.f32 1e-05, %v1625_v8 }
 0xe16   :  { %2489 = vrsqrt.f32 %v1626_v40 }
 0xe20   :  { %v2490_v45 = vpop.eup %2489 }
 0xe21   :  { %v1628_v9 = vmul.f32 %v2490_v45, %v1620_v41 }
 0xe23   :  { %v1636_v10 = vmul.f32 %v2079_v53, %v1628_v9 }
 0xe25   :  { %v1644_v11 = vadd.f32 %v2080_v46, %v1636_v10 }
 0xe27   :  { %v1645_v12 = vpack.c.bf16 %v1644_v11, %v1644_v11 }
 0xe29   :  { %1787 = vmatmul.mubr.bf16.vlgmr.msra.gmra.mrb[44].mxu1 %v1645_v12 }
 0xefc   :  { %v1788_v20 = vpop.f32.mrb[44].mxu1 }
 0xefd   :  { %v1789_v21 = vadd.f32 %v1788_v20, %v1667_v17  ;;  %v1790_v22 = vpop.f32.mrb[45].mxu1 }
 0xefe   :  { %v1791_v24 = vadd.f32 %v1790_v22, %v1671_v19  ;;  %v1792_v25 = vpop.f32.mrb[46].mxu1 }
 0xeff   :  { %v1795_v1 = vmax.f32 %v1789_v21, 0.0  ;;  %v1793_v26 = vpop.f32.mrb[47].mxu1 }
 0xf00   :  { %v1796_v27 = vmax.f32 %v1791_v24, 0.0 }
 0xf01   :  { %v1797_v31 = vpack.c.bf16 %v1795_v1, %v1795_v1 }
 0xf02   :  { %v1798_v28 = vpack.c.bf16 %v1796_v27, %v1796_v27 }
 0xf04   :  { %1966 = vmatprep.mubr.bf16.mxu0 %v1798_v28 }
 0xf05   :  { %1967 = vmatmul.mubr.bf16.vlgmr.msra.gmra.mrb[32].mxu0 %v1797_v31 }
 0xfd8   :  { %v2185_v33 = vpop.f32.mrb[32].mxu0 }
 0xfd9   :  { %v2186_v35 = vpop.f32.mrb[33].mxu0 }
 0xfda   :  { %v2187_v36 = vadd.f32 %v2186_v35, %v2185_v33  ;;  %v2188_v32 = vpop.f32.mrb[34].mxu0 }
 0xfdb   :  { %v2189_v37 = vpop.f32.mrb[35].mxu0 }
 0xfdc   :  { %v1969_v29 = vadd.f32 %v2187_v36, %v2097_v34 }
 0xfde   :  { %v1974_v30 = vadd.f32 %v1969_v29, %v1644_v11 }
 0xfe0   :  { %v1975_v38 = vsel %vm1614_vm6, %v1974_v30, 0.0 }
 0xfe1   :  { %1976 = vadd.xlane.f32.xlu0 %v1975_v38 }
0x106e   :  { %v1977_v39 = vpop.xlane.xlu0 %1976 }
0x106f   :  { %v1978_v23 = vmul.f32 0.0078125, %v1977_v39 }
0x1071   :  { %v1979_v0 = vsub.f32 %v1974_v30, %v1978_v23 }
0x1073   :  { %v1980_v41 = vmul.f32 %v1979_v0, %v1979_v0 }
0x1075   :  { %v1981_v42 = vsel %vm1614_vm6, %v1980_v41, 0.0 }
0x1076   :  { %1982 = vadd.xlane.f32.xlu1 %v1981_v42 }
0x1103   :  { %v1983_v44 = vpop.xlane.xlu1 %1982 }
0x1104   :  { %v1984_v47 = vmul.f32 0.0078125, %v1983_v44 }
0x1106   :  { %v1985_v48 = vadd.f32 1e-05, %v1984_v47 }
0x1108   :  { %2491 = vrsqrt.f32 %v1985_v48 }
0x1112   :  { %v2492_v49 = vpop.eup %2491 }
0x1113   :  { %v1987_v51 = vmul.f32 %v2492_v49, %v1979_v0 }
0x1115   :  { %v1995_v54 = vmul.f32 %v2114_v50, %v1987_v51 }
0x1117   :  { %v2003_v55 = vadd.f32 %v2115_v52, %v1995_v54 }
0x1119   :  { %2004 = vst [vmem:[#allocation23] sm:$0xf] %v2003_v55 }
0x111a   :  { %2790 = shalt.err (!%p2787_p10)
}
0x111b   :  { %s2791_s30 = scalar_lea.hbm %s3317_s13, 64 }
0x111c   :  { %p2792_p11 = scmp.ne.s32.totalorder %s3317_s13, %s2791_s30  ;;  %p2795_p12 = scmp.lt.u32.totalorder %s2791_s30, %s3317_s13 }
0x111e   :  { %p2797_p13 = pnand %p2795_p12, %p2792_p11 }
0x1120   :  { %2800 = shalt.err (!%p2797_p13)
}
0x1121   :  { %2014 = dma.vmem_to_hbm [thread:$0]  %s2012_s6, 64, %s3317_s13, [#allocation4]  }
0x1122   :  { %2815 = dma.done.wait [#allocation4], 64  }
0x1123   :  { %2816 = vsyncadd [#allocation4], 4294967232 }
0x1124   :  { %2018 = vsyncpa [#allocation3], 1 }
0x1125   :  { %2019 = vsyncpa [#allocation6], 1 }
0x1126   :  { %2020 = vsyncpa [#allocation9], 1 }
0x1127   :  { %2021 = vsyncpa [#allocation12], 1 }
0x1128   :  { %2022 = vsyncpa [#allocation15], 1 }
0x1129   :  { %2023 = vsyncpa [#allocation18], 1 }
0x112a   :  { %2024 = vsyncpa [#allocation21], 1 }
0x112b   :  { %2025 = vsyncpa [#allocation4], 1 }

</bundles_post_ra>
